<compile_context>
chip_gen: v7x
topology: tpu7x:2x2x1
jax: 0.10.0
libtpu: 0.0.40
codegen_flags: <defaults>
</compile_context>

<pallas_src>
import functools

import jax
import jax.numpy as jnp
from jax.experimental import pallas as pl
from jax.experimental.pallas import tpu as pltpu


def _ladder_kernel(x_ref, w_ref, b_ref, o_ref, *, C: int, O: int, W: int):
    # x_ref : (NB, C, H*W)   VMEM — flat spatial on lanes (lane-dense)
    # w_ref : (3 * O * C,)   SMEM — flat ladder weights, index [t*O*C + o*C + c]
    # b_ref : (O,)           SMEM — bias
    # o_ref : (NB, O, H*W)   VMEM — padded output (junk last row/col, sliced in wrapper)
    HW = x_ref.shape[-1]
    OC = O * C

    x = x_ref[...].astype(jnp.float32)                 # (NB, C, HW), f32 accumulation

    # Ladder taps, built once per *input* channel with circular lane rolls:
    #   tap1[p] = x[p + W]     (row i+1, col j)
    #   tap2[p] = x[p + W + 1] (row i+1, col j+1)
    # Wrap-around only contaminates the padded last row / last column of the
    # output, which the wrapper slices off.
    xs, t1s, t2s = [], [], []
    for c in range(C):
        p0 = x[:, c, :]                                # (NB, HW)
        p1 = pltpu.roll(p0, HW - W, axis=1)            # shift "left" by W
        p2 = pltpu.roll(p1, HW - 1, axis=1)            # shared: tap2 = roll(tap1, 1)
        xs.append(p0)
        t1s.append(p1)
        t2s.append(p2)

    # Channel contraction: C=4, O=8 is far too small for the MXU, so it is done
    # as unrolled scalar-broadcast FMAs on the VPU over pre-aligned taps.
    # TODO(synk): for production channel counts (C, O >= ~32) switch this to an
    # MXU contraction (stack the 3 taps along K=3C, one (M x 3C)·(3C x O) dot).
    for o in range(O):
        acc = b_ref[o] + w_ref[o * C] * xs[0]          # bias folded into first FMA
        acc = acc + w_ref[OC + o * C] * t1s[0]
        acc = acc + w_ref[2 * OC + o * C] * t2s[0]
        for c in range(1, C):
            acc = acc + w_ref[o * C + c] * xs[c]
            acc = acc + w_ref[OC + o * C + c] * t1s[c]
            acc = acc + w_ref[2 * OC + o * C + c] * t2s[c]
        o_ref[:, o, :] = acc.astype(o_ref.dtype)       # lane-dense (HW-wide) store


def ladder_conv(x_nchw, weight, bias, *, target_tile_bytes=1 << 20):
    """x_nchw: (N, C, H, W); weight: (3, O, C); bias: (O,) -> (N, O, H-1, W-1)."""
    N, C, H, W = x_nchw.shape
    three, O, C2 = weight.shape
    assert three == 3 and C2 == C, (weight.shape, x_nchw.shape)
    HW = H * W

    # Images per grid step: aim for ~1 MiB input tiles (per-step overhead is
    # ~0.35 us, so tiny tiles are pure overhead), but keep >= 2 grid steps so
    # the "parallel" batch axis can shard across v7x's two TensorCores.
    itemsize = jnp.dtype(x_nchw.dtype).itemsize
    nb = max(1, target_tile_bytes // max(1, C * HW * itemsize))
    if N >= 2:
        nb = min(nb, pl.cdiv(N, 2))
    nb = min(nb, N)

    n_pad = (-N) % nb
    x_flat = x_nchw.reshape(N, C, HW)                  # contiguous flatten (free)
    if n_pad:
        x_flat = jnp.pad(x_flat, ((0, n_pad), (0, 0), (0, 0)))
    n_total = N + n_pad

    # Tiny parameter tensors -> flat f32 arrays living in SMEM inside the kernel.
    w_flat = weight.astype(jnp.float32).reshape(3 * O * C)
    b_flat = bias.astype(jnp.float32).reshape(O)

    kernel = functools.partial(_ladder_kernel, C=C, O=O, W=W)

    out_flat = pl.pallas_call(
        kernel,
        out_shape=jax.ShapeDtypeStruct((n_total, O, HW), x_nchw.dtype),
        grid_spec=pltpu.PrefetchScalarGridSpec(
            num_scalar_prefetch=0,
            grid=(n_total // nb,),
            in_specs=[
                pl.BlockSpec((nb, C, HW), lambda n: (n, 0, 0)),
                pl.BlockSpec(memory_space=pltpu.MemorySpace.SMEM),  # weights
                pl.BlockSpec(memory_space=pltpu.MemorySpace.SMEM),  # bias
            ],
            out_specs=pl.BlockSpec((nb, O, HW), lambda n: (n, 0, 0)),
        ),
        compiler_params=pltpu.CompilerParams(
            dimension_semantics=("parallel",),
            vmem_limit_bytes=32 * 1024 * 1024,
        ),
    )(x_flat, w_flat, b_flat)

    # Padded, lane-dense output -> drop batch padding and the junk last row/col.
    out = out_flat[:N].reshape(N, O, H, W)[:, :, : H - 1, : W - 1]
    return out


def _reference(x_nchw, weight, bias):
    """Pure-JAX reference of the PyTorch forward (correctness check)."""
    w0, w1, w2 = weight[0], weight[1], weight[2]          # each (O, C)
    a = x_nchw[:, :, :-1, :-1]                            # (N, C, H-1, W-1)
    b = x_nchw[:, :, 1:, :-1]
    c = x_nchw[:, :, 1:, 1:]
    out = (jnp.einsum('nchw,oc->nohw', a, w0)
           + jnp.einsum('nchw,oc->nohw', b, w1)
           + jnp.einsum('nchw,oc->nohw', c, w2))
    return out + bias[None, :, None, None]


if __name__ == "__main__":
    key = jax.random.PRNGKey(0)
    k_x, k_w = jax.random.split(key)

    N, C_in, H, W = 2, 4, 16, 16
    C_out = 8

    x = jax.random.normal(k_x, (N, C_in, H, W), dtype=jnp.float32)

    # Deterministic stand-in for nn.init.kaiming_normal_ on (3, O, I):
    # fan_in for that tensor is in_channel; std = sqrt(2 / fan_in).
    std = (2.0 / C_in) ** 0.5
    weight = std * jax.random.normal(k_w, (3, C_out, C_in), dtype=jnp.float32)
    bias = jnp.zeros((C_out,), dtype=jnp.float32)

    out = jax.block_until_ready(ladder_conv(x, weight, bias))

    ref = _reference(x, weight, bias)
    assert out.shape == (N, C_out, H - 1, W - 1), out.shape
    assert jnp.allclose(out, ref, atol=1e-4, rtol=1e-4), "mismatch vs reference"

    print("KERNEL_OK")
</pallas_src>

<mosaic_0001>
module attributes {stable_mosaic.version = 11 : i64} {
  func.func @_ladder_kernel(%arg0: i32, %arg1: memref<1x4x256xf32, #tpu.memory_space<vmem>>, %arg2: memref<96xf32, #tpu.memory_space<smem>>, %arg3: memref<8xf32, #tpu.memory_space<smem>>, %arg4: memref<1x8x256xf32, #tpu.memory_space<vmem>>) attributes {dimension_semantics = [#tpu.dimension_semantics<parallel>], iteration_bounds = array<i64: 2>, scalar_prefetch = 0 : i64, scratch_operands = 0 : i64, tpu.core_type = #tpu.core_type<tc>, window_params = [{transform_indices = @transform_0, window_bounds = array<i64: 1, 4, 256>}, {transform_indices = @transform_1, window_bounds = array<i64: 96>}, {transform_indices = @transform_2, window_bounds = array<i64: 8>}, {transform_indices = @transform_3, window_bounds = array<i64: 1, 8, 256>}]} {
    %c0 = arith.constant 0 : index
    %c0_0 = arith.constant 0 : index
    %c0_1 = arith.constant 0 : index
    %0 = vector.load %arg1[%c0, %c0_0, %c0_1] : memref<1x4x256xf32, #tpu.memory_space<vmem>>, vector<1x4x256xf32>
    %1 = vector.extract_strided_slice %0 {offsets = [0, 0, 0], sizes = [1, 1, 256], strides = [1, 1, 1]} : vector<1x4x256xf32> to vector<1x1x256xf32>
    %2 = vector.shape_cast %1 : vector<1x1x256xf32> to vector<1x256xf32>
    %c240_i32 = arith.constant 240 : i32
    %3 = tpu.dynamic_rotate %2 by %c240_i32 dim 1 : vector<1x256xf32>, i32 -> vector<1x256xf32>
    %c255_i32 = arith.constant 255 : i32
    %4 = tpu.dynamic_rotate %3 by %c255_i32 dim 1 : vector<1x256xf32>, i32 -> vector<1x256xf32>
    %5 = vector.extract_strided_slice %0 {offsets = [0, 1, 0], sizes = [1, 1, 256], strides = [1, 1, 1]} : vector<1x4x256xf32> to vector<1x1x256xf32>
    %6 = vector.shape_cast %5 : vector<1x1x256xf32> to vector<1x256xf32>
    %c240_i32_2 = arith.constant 240 : i32
    %7 = tpu.dynamic_rotate %6 by %c240_i32_2 dim 1 : vector<1x256xf32>, i32 -> vector<1x256xf32>
    %c255_i32_3 = arith.constant 255 : i32
    %8 = tpu.dynamic_rotate %7 by %c255_i32_3 dim 1 : vector<1x256xf32>, i32 -> vector<1x256xf32>
    %9 = vector.extract_strided_slice %0 {offsets = [0, 2, 0], sizes = [1, 1, 256], strides = [1, 1, 1]} : vector<1x4x256xf32> to vector<1x1x256xf32>
    %10 = vector.shape_cast %9 : vector<1x1x256xf32> to vector<1x256xf32>
    %c240_i32_4 = arith.constant 240 : i32
    %11 = tpu.dynamic_rotate %10 by %c240_i32_4 dim 1 : vector<1x256xf32>, i32 -> vector<1x256xf32>
    %c255_i32_5 = arith.constant 255 : i32
    %12 = tpu.dynamic_rotate %11 by %c255_i32_5 dim 1 : vector<1x256xf32>, i32 -> vector<1x256xf32>
    %13 = vector.extract_strided_slice %0 {offsets = [0, 3, 0], sizes = [1, 1, 256], strides = [1, 1, 1]} : vector<1x4x256xf32> to vector<1x1x256xf32>
    %14 = vector.shape_cast %13 : vector<1x1x256xf32> to vector<1x256xf32>
    %c240_i32_6 = arith.constant 240 : i32
    %15 = tpu.dynamic_rotate %14 by %c240_i32_6 dim 1 : vector<1x256xf32>, i32 -> vector<1x256xf32>
    %c255_i32_7 = arith.constant 255 : i32
    %16 = tpu.dynamic_rotate %15 by %c255_i32_7 dim 1 : vector<1x256xf32>, i32 -> vector<1x256xf32>
    %c0_8 = arith.constant 0 : index
    %17 = memref.load %arg3[%c0_8] : memref<8xf32, #tpu.memory_space<smem>>
    %c0_9 = arith.constant 0 : index
    %18 = memref.load %arg2[%c0_9] : memref<96xf32, #tpu.memory_space<smem>>
    %19 = vector.broadcast %18 : f32 to vector<1x256xf32>
    %20 = arith.mulf %19, %2 : vector<1x256xf32>
    %21 = vector.broadcast %17 : f32 to vector<1x256xf32>
    %22 = arith.addf %21, %20 : vector<1x256xf32>
    %c32 = arith.constant 32 : index
    %23 = memref.load %arg2[%c32] : memref<96xf32, #tpu.memory_space<smem>>
    %24 = vector.broadcast %23 : f32 to vector<1x256xf32>
    %25 = arith.mulf %24, %3 : vector<1x256xf32>
    %26 = arith.addf %22, %25 : vector<1x256xf32>
    %c64 = arith.constant 64 : index
    %27 = memref.load %arg2[%c64] : memref<96xf32, #tpu.memory_space<smem>>
    %28 = vector.broadcast %27 : f32 to vector<1x256xf32>
    %29 = arith.mulf %28, %4 : vector<1x256xf32>
    %30 = arith.addf %26, %29 : vector<1x256xf32>
    %c1 = arith.constant 1 : index
    %31 = memref.load %arg2[%c1] : memref<96xf32, #tpu.memory_space<smem>>
    %32 = vector.broadcast %31 : f32 to vector<1x256xf32>
    %33 = arith.mulf %32, %6 : vector<1x256xf32>
    %34 = arith.addf %30, %33 : vector<1x256xf32>
    %c33 = arith.constant 33 : index
    %35 = memref.load %arg2[%c33] : memref<96xf32, #tpu.memory_space<smem>>
    %36 = vector.broadcast %35 : f32 to vector<1x256xf32>
    %37 = arith.mulf %36, %7 : vector<1x256xf32>
    %38 = arith.addf %34, %37 : vector<1x256xf32>
    %c65 = arith.constant 65 : index
    %39 = memref.load %arg2[%c65] : memref<96xf32, #tpu.memory_space<smem>>
    %40 = vector.broadcast %39 : f32 to vector<1x256xf32>
    %41 = arith.mulf %40, %8 : vector<1x256xf32>
    %42 = arith.addf %38, %41 : vector<1x256xf32>
    %c2 = arith.constant 2 : index
    %43 = memref.load %arg2[%c2] : memref<96xf32, #tpu.memory_space<smem>>
    %44 = vector.broadcast %43 : f32 to vector<1x256xf32>
    %45 = arith.mulf %44, %10 : vector<1x256xf32>
    %46 = arith.addf %42, %45 : vector<1x256xf32>
    %c34 = arith.constant 34 : index
    %47 = memref.load %arg2[%c34] : memref<96xf32, #tpu.memory_space<smem>>
    %48 = vector.broadcast %47 : f32 to vector<1x256xf32>
    %49 = arith.mulf %48, %11 : vector<1x256xf32>
    %50 = arith.addf %46, %49 : vector<1x256xf32>
    %c66 = arith.constant 66 : index
    %51 = memref.load %arg2[%c66] : memref<96xf32, #tpu.memory_space<smem>>
    %52 = vector.broadcast %51 : f32 to vector<1x256xf32>
    %53 = arith.mulf %52, %12 : vector<1x256xf32>
    %54 = arith.addf %50, %53 : vector<1x256xf32>
    %c3 = arith.constant 3 : index
    %55 = memref.load %arg2[%c3] : memref<96xf32, #tpu.memory_space<smem>>
    %56 = vector.broadcast %55 : f32 to vector<1x256xf32>
    %57 = arith.mulf %56, %14 : vector<1x256xf32>
    %58 = arith.addf %54, %57 : vector<1x256xf32>
    %c35 = arith.constant 35 : index
    %59 = memref.load %arg2[%c35] : memref<96xf32, #tpu.memory_space<smem>>
    %60 = vector.broadcast %59 : f32 to vector<1x256xf32>
    %61 = arith.mulf %60, %15 : vector<1x256xf32>
    %62 = arith.addf %58, %61 : vector<1x256xf32>
    %c67 = arith.constant 67 : index
    %63 = memref.load %arg2[%c67] : memref<96xf32, #tpu.memory_space<smem>>
    %64 = vector.broadcast %63 : f32 to vector<1x256xf32>
    %65 = arith.mulf %64, %16 : vector<1x256xf32>
    %66 = arith.addf %62, %65 : vector<1x256xf32>
    %c0_10 = arith.constant 0 : index
    %c0_11 = arith.constant 0 : index
    %c0_12 = arith.constant 0 : index
    %67 = vector.load %arg4[%c0_10, %c0_11, %c0_12] : memref<1x8x256xf32, #tpu.memory_space<vmem>>, vector<1x1x256xf32>
    %68 = vector.shape_cast %67 : vector<1x1x256xf32> to vector<1x256xf32>
    %69 = vector.shape_cast %66 : vector<1x256xf32> to vector<1x1x256xf32>
    tpu.vector_store %arg4[%c0_10, %c0_11, %c0_12], %69 {strides = array<i32>} : memref<1x8x256xf32, #tpu.memory_space<vmem>>, vector<1x1x256xf32>,
    %c1_13 = arith.constant 1 : index
    %70 = memref.load %arg3[%c1_13] : memref<8xf32, #tpu.memory_space<smem>>
    %c4 = arith.constant 4 : index
    %71 = memref.load %arg2[%c4] : memref<96xf32, #tpu.memory_space<smem>>
    %72 = vector.broadcast %71 : f32 to vector<1x256xf32>
    %73 = arith.mulf %72, %2 : vector<1x256xf32>
    %74 = vector.broadcast %70 : f32 to vector<1x256xf32>
    %75 = arith.addf %74, %73 : vector<1x256xf32>
    %c36 = arith.constant 36 : index
    %76 = memref.load %arg2[%c36] : memref<96xf32, #tpu.memory_space<smem>>
    %77 = vector.broadcast %76 : f32 to vector<1x256xf32>
    %78 = arith.mulf %77, %3 : vector<1x256xf32>
    %79 = arith.addf %75, %78 : vector<1x256xf32>
    %c68 = arith.constant 68 : index
    %80 = memref.load %arg2[%c68] : memref<96xf32, #tpu.memory_space<smem>>
    %81 = vector.broadcast %80 : f32 to vector<1x256xf32>
    %82 = arith.mulf %81, %4 : vector<1x256xf32>
    %83 = arith.addf %79, %82 : vector<1x256xf32>
    %c5 = arith.constant 5 : index
    %84 = memref.load %arg2[%c5] : memref<96xf32, #tpu.memory_space<smem>>
    %85 = vector.broadcast %84 : f32 to vector<1x256xf32>
    %86 = arith.mulf %85, %6 : vector<1x256xf32>
    %87 = arith.addf %83, %86 : vector<1x256xf32>
    %c37 = arith.constant 37 : index
    %88 = memref.load %arg2[%c37] : memref<96xf32, #tpu.memory_space<smem>>
    %89 = vector.broadcast %88 : f32 to vector<1x256xf32>
    %90 = arith.mulf %89, %7 : vector<1x256xf32>
    %91 = arith.addf %87, %90 : vector<1x256xf32>
    %c69 = arith.constant 69 : index
    %92 = memref.load %arg2[%c69] : memref<96xf32, #tpu.memory_space<smem>>
    %93 = vector.broadcast %92 : f32 to vector<1x256xf32>
    %94 = arith.mulf %93, %8 : vector<1x256xf32>
    %95 = arith.addf %91, %94 : vector<1x256xf32>
    %c6 = arith.constant 6 : index
    %96 = memref.load %arg2[%c6] : memref<96xf32, #tpu.memory_space<smem>>
    %97 = vector.broadcast %96 : f32 to vector<1x256xf32>
    %98 = arith.mulf %97, %10 : vector<1x256xf32>
    %99 = arith.addf %95, %98 : vector<1x256xf32>
    %c38 = arith.constant 38 : index
    %100 = memref.load %arg2[%c38] : memref<96xf32, #tpu.memory_space<smem>>
    %101 = vector.broadcast %100 : f32 to vector<1x256xf32>
    %102 = arith.mulf %101, %11 : vector<1x256xf32>
    %103 = arith.addf %99, %102 : vector<1x256xf32>
    %c70 = arith.constant 70 : index
    %104 = memref.load %arg2[%c70] : memref<96xf32, #tpu.memory_space<smem>>
    %105 = vector.broadcast %104 : f32 to vector<1x256xf32>
    %106 = arith.mulf %105, %12 : vector<1x256xf32>
    %107 = arith.addf %103, %106 : vector<1x256xf32>
    %c7 = arith.constant 7 : index
    %108 = memref.load %arg2[%c7] : memref<96xf32, #tpu.memory_space<smem>>
    %109 = vector.broadcast %108 : f32 to vector<1x256xf32>
    %110 = arith.mulf %109, %14 : vector<1x256xf32>
    %111 = arith.addf %107, %110 : vector<1x256xf32>
    %c39 = arith.constant 39 : index
    %112 = memref.load %arg2[%c39] : memref<96xf32, #tpu.memory_space<smem>>
    %113 = vector.broadcast %112 : f32 to vector<1x256xf32>
    %114 = arith.mulf %113, %15 : vector<1x256xf32>
    %115 = arith.addf %111, %114 : vector<1x256xf32>
    %c71 = arith.constant 71 : index
    %116 = memref.load %arg2[%c71] : memref<96xf32, #tpu.memory_space<smem>>
    %117 = vector.broadcast %116 : f32 to vector<1x256xf32>
    %118 = arith.mulf %117, %16 : vector<1x256xf32>
    %119 = arith.addf %115, %118 : vector<1x256xf32>
    %c0_14 = arith.constant 0 : index
    %c1_15 = arith.constant 1 : index
    %c0_16 = arith.constant 0 : index
    %120 = vector.load %arg4[%c0_14, %c1_15, %c0_16] : memref<1x8x256xf32, #tpu.memory_space<vmem>>, vector<1x1x256xf32>
    %121 = vector.shape_cast %120 : vector<1x1x256xf32> to vector<1x256xf32>
    %122 = vector.shape_cast %119 : vector<1x256xf32> to vector<1x1x256xf32>
    tpu.vector_store %arg4[%c0_14, %c1_15, %c0_16], %122 {strides = array<i32>} : memref<1x8x256xf32, #tpu.memory_space<vmem>>, vector<1x1x256xf32>,
    %c2_17 = arith.constant 2 : index
    %123 = memref.load %arg3[%c2_17] : memref<8xf32, #tpu.memory_space<smem>>
    %c8 = arith.constant 8 : index
    %124 = memref.load %arg2[%c8] : memref<96xf32, #tpu.memory_space<smem>>
    %125 = vector.broadcast %124 : f32 to vector<1x256xf32>
    %126 = arith.mulf %125, %2 : vector<1x256xf32>
    %127 = vector.broadcast %123 : f32 to vector<1x256xf32>
    %128 = arith.addf %127, %126 : vector<1x256xf32>
    %c40 = arith.constant 40 : index
    %129 = memref.load %arg2[%c40] : memref<96xf32, #tpu.memory_space<smem>>
    %130 = vector.broadcast %129 : f32 to vector<1x256xf32>
    %131 = arith.mulf %130, %3 : vector<1x256xf32>
    %132 = arith.addf %128, %131 : vector<1x256xf32>
    %c72 = arith.constant 72 : index
    %133 = memref.load %arg2[%c72] : memref<96xf32, #tpu.memory_space<smem>>
    %134 = vector.broadcast %133 : f32 to vector<1x256xf32>
    %135 = arith.mulf %134, %4 : vector<1x256xf32>
    %136 = arith.addf %132, %135 : vector<1x256xf32>
    %c9 = arith.constant 9 : index
    %137 = memref.load %arg2[%c9] : memref<96xf32, #tpu.memory_space<smem>>
    %138 = vector.broadcast %137 : f32 to vector<1x256xf32>
    %139 = arith.mulf %138, %6 : vector<1x256xf32>
    %140 = arith.addf %136, %139 : vector<1x256xf32>
    %c41 = arith.constant 41 : index
    %141 = memref.load %arg2[%c41] : memref<96xf32, #tpu.memory_space<smem>>
    %142 = vector.broadcast %141 : f32 to vector<1x256xf32>
    %143 = arith.mulf %142, %7 : vector<1x256xf32>
    %144 = arith.addf %140, %143 : vector<1x256xf32>
    %c73 = arith.constant 73 : index
    %145 = memref.load %arg2[%c73] : memref<96xf32, #tpu.memory_space<smem>>
    %146 = vector.broadcast %145 : f32 to vector<1x256xf32>
    %147 = arith.mulf %146, %8 : vector<1x256xf32>
    %148 = arith.addf %144, %147 : vector<1x256xf32>
    %c10 = arith.constant 10 : index
    %149 = memref.load %arg2[%c10] : memref<96xf32, #tpu.memory_space<smem>>
    %150 = vector.broadcast %149 : f32 to vector<1x256xf32>
    %151 = arith.mulf %150, %10 : vector<1x256xf32>
    %152 = arith.addf %148, %151 : vector<1x256xf32>
    %c42 = arith.constant 42 : index
    %153 = memref.load %arg2[%c42] : memref<96xf32, #tpu.memory_space<smem>>
    %154 = vector.broadcast %153 : f32 to vector<1x256xf32>
    %155 = arith.mulf %154, %11 : vector<1x256xf32>
    %156 = arith.addf %152, %155 : vector<1x256xf32>
    %c74 = arith.constant 74 : index
    %157 = memref.load %arg2[%c74] : memref<96xf32, #tpu.memory_space<smem>>
    %158 = vector.broadcast %157 : f32 to vector<1x256xf32>
    %159 = arith.mulf %158, %12 : vector<1x256xf32>
    %160 = arith.addf %156, %159 : vector<1x256xf32>
    %c11 = arith.constant 11 : index
    %161 = memref.load %arg2[%c11] : memref<96xf32, #tpu.memory_space<smem>>
    %162 = vector.broadcast %161 : f32 to vector<1x256xf32>
    %163 = arith.mulf %162, %14 : vector<1x256xf32>
    %164 = arith.addf %160, %163 : vector<1x256xf32>
    %c43 = arith.constant 43 : index
    %165 = memref.load %arg2[%c43] : memref<96xf32, #tpu.memory_space<smem>>
    %166 = vector.broadcast %165 : f32 to vector<1x256xf32>
    %167 = arith.mulf %166, %15 : vector<1x256xf32>
    %168 = arith.addf %164, %167 : vector<1x256xf32>
    %c75 = arith.constant 75 : index
    %169 = memref.load %arg2[%c75] : memref<96xf32, #tpu.memory_space<smem>>
    %170 = vector.broadcast %169 : f32 to vector<1x256xf32>
    %171 = arith.mulf %170, %16 : vector<1x256xf32>
    %172 = arith.addf %168, %171 : vector<1x256xf32>
    %c0_18 = arith.constant 0 : index
    %c2_19 = arith.constant 2 : index
    %c0_20 = arith.constant 0 : index
    %173 = vector.load %arg4[%c0_18, %c2_19, %c0_20] : memref<1x8x256xf32, #tpu.memory_space<vmem>>, vector<1x1x256xf32>
    %174 = vector.shape_cast %173 : vector<1x1x256xf32> to vector<1x256xf32>
    %175 = vector.shape_cast %172 : vector<1x256xf32> to vector<1x1x256xf32>
    tpu.vector_store %arg4[%c0_18, %c2_19, %c0_20], %175 {strides = array<i32>} : memref<1x8x256xf32, #tpu.memory_space<vmem>>, vector<1x1x256xf32>,
    %c3_21 = arith.constant 3 : index
    %176 = memref.load %arg3[%c3_21] : memref<8xf32, #tpu.memory_space<smem>>
    %c12 = arith.constant 12 : index
    %177 = memref.load %arg2[%c12] : memref<96xf32, #tpu.memory_space<smem>>
    %178 = vector.broadcast %177 : f32 to vector<1x256xf32>
    %179 = arith.mulf %178, %2 : vector<1x256xf32>
    %180 = vector.broadcast %176 : f32 to vector<1x256xf32>
    %181 = arith.addf %180, %179 : vector<1x256xf32>
    %c44 = arith.constant 44 : index
    %182 = memref.load %arg2[%c44] : memref<96xf32, #tpu.memory_space<smem>>
    %183 = vector.broadcast %182 : f32 to vector<1x256xf32>
    %184 = arith.mulf %183, %3 : vector<1x256xf32>
    %185 = arith.addf %181, %184 : vector<1x256xf32>
    %c76 = arith.constant 76 : index
    %186 = memref.load %arg2[%c76] : memref<96xf32, #tpu.memory_space<smem>>
    %187 = vector.broadcast %186 : f32 to vector<1x256xf32>
    %188 = arith.mulf %187, %4 : vector<1x256xf32>
    %189 = arith.addf %185, %188 : vector<1x256xf32>
    %c13 = arith.constant 13 : index
    %190 = memref.load %arg2[%c13] : memref<96xf32, #tpu.memory_space<smem>>
    %191 = vector.broadcast %190 : f32 to vector<1x256xf32>
    %192 = arith.mulf %191, %6 : vector<1x256xf32>
    %193 = arith.addf %189, %192 : vector<1x256xf32>
    %c45 = arith.constant 45 : index
    %194 = memref.load %arg2[%c45] : memref<96xf32, #tpu.memory_space<smem>>
    %195 = vector.broadcast %194 : f32 to vector<1x256xf32>
    %196 = arith.mulf %195, %7 : vector<1x256xf32>
    %197 = arith.addf %193, %196 : vector<1x256xf32>
    %c77 = arith.constant 77 : index
    %198 = memref.load %arg2[%c77] : memref<96xf32, #tpu.memory_space<smem>>
    %199 = vector.broadcast %198 : f32 to vector<1x256xf32>
    %200 = arith.mulf %199, %8 : vector<1x256xf32>
    %201 = arith.addf %197, %200 : vector<1x256xf32>
    %c14 = arith.constant 14 : index
    %202 = memref.load %arg2[%c14] : memref<96xf32, #tpu.memory_space<smem>>
    %203 = vector.broadcast %202 : f32 to vector<1x256xf32>
    %204 = arith.mulf %203, %10 : vector<1x256xf32>
    %205 = arith.addf %201, %204 : vector<1x256xf32>
    %c46 = arith.constant 46 : index
    %206 = memref.load %arg2[%c46] : memref<96xf32, #tpu.memory_space<smem>>
    %207 = vector.broadcast %206 : f32 to vector<1x256xf32>
    %208 = arith.mulf %207, %11 : vector<1x256xf32>
    %209 = arith.addf %205, %208 : vector<1x256xf32>
    %c78 = arith.constant 78 : index
    %210 = memref.load %arg2[%c78] : memref<96xf32, #tpu.memory_space<smem>>
    %211 = vector.broadcast %210 : f32 to vector<1x256xf32>
    %212 = arith.mulf %211, %12 : vector<1x256xf32>
    %213 = arith.addf %209, %212 : vector<1x256xf32>
    %c15 = arith.constant 15 : index
    %214 = memref.load %arg2[%c15] : memref<96xf32, #tpu.memory_space<smem>>
    %215 = vector.broadcast %214 : f32 to vector<1x256xf32>
    %216 = arith.mulf %215, %14 : vector<1x256xf32>
    %217 = arith.addf %213, %216 : vector<1x256xf32>
    %c47 = arith.constant 47 : index
    %218 = memref.load %arg2[%c47] : memref<96xf32, #tpu.memory_space<smem>>
    %219 = vector.broadcast %218 : f32 to vector<1x256xf32>
    %220 = arith.mulf %219, %15 : vector<1x256xf32>
    %221 = arith.addf %217, %220 : vector<1x256xf32>
    %c79 = arith.constant 79 : index
    %222 = memref.load %arg2[%c79] : memref<96xf32, #tpu.memory_space<smem>>
    %223 = vector.broadcast %222 : f32 to vector<1x256xf32>
    %224 = arith.mulf %223, %16 : vector<1x256xf32>
    %225 = arith.addf %221, %224 : vector<1x256xf32>
    %c0_22 = arith.constant 0 : index
    %c3_23 = arith.constant 3 : index
    %c0_24 = arith.constant 0 : index
    %226 = vector.load %arg4[%c0_22, %c3_23, %c0_24] : memref<1x8x256xf32, #tpu.memory_space<vmem>>, vector<1x1x256xf32>
    %227 = vector.shape_cast %226 : vector<1x1x256xf32> to vector<1x256xf32>
    %228 = vector.shape_cast %225 : vector<1x256xf32> to vector<1x1x256xf32>
    tpu.vector_store %arg4[%c0_22, %c3_23, %c0_24], %228 {strides = array<i32>} : memref<1x8x256xf32, #tpu.memory_space<vmem>>, vector<1x1x256xf32>,
    %c4_25 = arith.constant 4 : index
    %229 = memref.load %arg3[%c4_25] : memref<8xf32, #tpu.memory_space<smem>>
    %c16 = arith.constant 16 : index
    %230 = memref.load %arg2[%c16] : memref<96xf32, #tpu.memory_space<smem>>
    %231 = vector.broadcast %230 : f32 to vector<1x256xf32>
    %232 = arith.mulf %231, %2 : vector<1x256xf32>
    %233 = vector.broadcast %229 : f32 to vector<1x256xf32>
    %234 = arith.addf %233, %232 : vector<1x256xf32>
    %c48 = arith.constant 48 : index
    %235 = memref.load %arg2[%c48] : memref<96xf32, #tpu.memory_space<smem>>
    %236 = vector.broadcast %235 : f32 to vector<1x256xf32>
    %237 = arith.mulf %236, %3 : vector<1x256xf32>
    %238 = arith.addf %234, %237 : vector<1x256xf32>
    %c80 = arith.constant 80 : index
    %239 = memref.load %arg2[%c80] : memref<96xf32, #tpu.memory_space<smem>>
    %240 = vector.broadcast %239 : f32 to vector<1x256xf32>
    %241 = arith.mulf %240, %4 : vector<1x256xf32>
    %242 = arith.addf %238, %241 : vector<1x256xf32>
    %c17 = arith.constant 17 : index
    %243 = memref.load %arg2[%c17] : memref<96xf32, #tpu.memory_space<smem>>
    %244 = vector.broadcast %243 : f32 to vector<1x256xf32>
    %245 = arith.mulf %244, %6 : vector<1x256xf32>
    %246 = arith.addf %242, %245 : vector<1x256xf32>
    %c49 = arith.constant 49 : index
    %247 = memref.load %arg2[%c49] : memref<96xf32, #tpu.memory_space<smem>>
    %248 = vector.broadcast %247 : f32 to vector<1x256xf32>
    %249 = arith.mulf %248, %7 : vector<1x256xf32>
    %250 = arith.addf %246, %249 : vector<1x256xf32>
    %c81 = arith.constant 81 : index
    %251 = memref.load %arg2[%c81] : memref<96xf32, #tpu.memory_space<smem>>
    %252 = vector.broadcast %251 : f32 to vector<1x256xf32>
    %253 = arith.mulf %252, %8 : vector<1x256xf32>
    %254 = arith.addf %250, %253 : vector<1x256xf32>
    %c18 = arith.constant 18 : index
    %255 = memref.load %arg2[%c18] : memref<96xf32, #tpu.memory_space<smem>>
    %256 = vector.broadcast %255 : f32 to vector<1x256xf32>
    %257 = arith.mulf %256, %10 : vector<1x256xf32>
    %258 = arith.addf %254, %257 : vector<1x256xf32>
    %c50 = arith.constant 50 : index
    %259 = memref.load %arg2[%c50] : memref<96xf32, #tpu.memory_space<smem>>
    %260 = vector.broadcast %259 : f32 to vector<1x256xf32>
    %261 = arith.mulf %260, %11 : vector<1x256xf32>
    %262 = arith.addf %258, %261 : vector<1x256xf32>
    %c82 = arith.constant 82 : index
    %263 = memref.load %arg2[%c82] : memref<96xf32, #tpu.memory_space<smem>>
    %264 = vector.broadcast %263 : f32 to vector<1x256xf32>
    %265 = arith.mulf %264, %12 : vector<1x256xf32>
    %266 = arith.addf %262, %265 : vector<1x256xf32>
    %c19 = arith.constant 19 : index
    %267 = memref.load %arg2[%c19] : memref<96xf32, #tpu.memory_space<smem>>
    %268 = vector.broadcast %267 : f32 to vector<1x256xf32>
    %269 = arith.mulf %268, %14 : vector<1x256xf32>
    %270 = arith.addf %266, %269 : vector<1x256xf32>
    %c51 = arith.constant 51 : index
    %271 = memref.load %arg2[%c51] : memref<96xf32, #tpu.memory_space<smem>>
    %272 = vector.broadcast %271 : f32 to vector<1x256xf32>
    %273 = arith.mulf %272, %15 : vector<1x256xf32>
    %274 = arith.addf %270, %273 : vector<1x256xf32>
    %c83 = arith.constant 83 : index
    %275 = memref.load %arg2[%c83] : memref<96xf32, #tpu.memory_space<smem>>
    %276 = vector.broadcast %275 : f32 to vector<1x256xf32>
    %277 = arith.mulf %276, %16 : vector<1x256xf32>
    %278 = arith.addf %274, %277 : vector<1x256xf32>
    %c0_26 = arith.constant 0 : index
    %c4_27 = arith.constant 4 : index
    %c0_28 = arith.constant 0 : index
    %279 = vector.load %arg4[%c0_26, %c4_27, %c0_28] : memref<1x8x256xf32, #tpu.memory_space<vmem>>, vector<1x1x256xf32>
    %280 = vector.shape_cast %279 : vector<1x1x256xf32> to vector<1x256xf32>
    %281 = vector.shape_cast %278 : vector<1x256xf32> to vector<1x1x256xf32>
    tpu.vector_store %arg4[%c0_26, %c4_27, %c0_28], %281 {strides = array<i32>} : memref<1x8x256xf32, #tpu.memory_space<vmem>>, vector<1x1x256xf32>,
    %c5_29 = arith.constant 5 : index
    %282 = memref.load %arg3[%c5_29] : memref<8xf32, #tpu.memory_space<smem>>
    %c20 = arith.constant 20 : index
    %283 = memref.load %arg2[%c20] : memref<96xf32, #tpu.memory_space<smem>>
    %284 = vector.broadcast %283 : f32 to vector<1x256xf32>
    %285 = arith.mulf %284, %2 : vector<1x256xf32>
    %286 = vector.broadcast %282 : f32 to vector<1x256xf32>
    %287 = arith.addf %286, %285 : vector<1x256xf32>
    %c52 = arith.constant 52 : index
    %288 = memref.load %arg2[%c52] : memref<96xf32, #tpu.memory_space<smem>>
    %289 = vector.broadcast %288 : f32 to vector<1x256xf32>
    %290 = arith.mulf %289, %3 : vector<1x256xf32>
    %291 = arith.addf %287, %290 : vector<1x256xf32>
    %c84 = arith.constant 84 : index
    %292 = memref.load %arg2[%c84] : memref<96xf32, #tpu.memory_space<smem>>
    %293 = vector.broadcast %292 : f32 to vector<1x256xf32>
    %294 = arith.mulf %293, %4 : vector<1x256xf32>
    %295 = arith.addf %291, %294 : vector<1x256xf32>
    %c21 = arith.constant 21 : index
    %296 = memref.load %arg2[%c21] : memref<96xf32, #tpu.memory_space<smem>>
    %297 = vector.broadcast %296 : f32 to vector<1x256xf32>
    %298 = arith.mulf %297, %6 : vector<1x256xf32>
    %299 = arith.addf %295, %298 : vector<1x256xf32>
    %c53 = arith.constant 53 : index
    %300 = memref.load %arg2[%c53] : memref<96xf32, #tpu.memory_space<smem>>
    %301 = vector.broadcast %300 : f32 to vector<1x256xf32>
    %302 = arith.mulf %301, %7 : vector<1x256xf32>
    %303 = arith.addf %299, %302 : vector<1x256xf32>
    %c85 = arith.constant 85 : index
    %304 = memref.load %arg2[%c85] : memref<96xf32, #tpu.memory_space<smem>>
    %305 = vector.broadcast %304 : f32 to vector<1x256xf32>
    %306 = arith.mulf %305, %8 : vector<1x256xf32>
    %307 = arith.addf %303, %306 : vector<1x256xf32>
    %c22 = arith.constant 22 : index
    %308 = memref.load %arg2[%c22] : memref<96xf32, #tpu.memory_space<smem>>
    %309 = vector.broadcast %308 : f32 to vector<1x256xf32>
    %310 = arith.mulf %309, %10 : vector<1x256xf32>
    %311 = arith.addf %307, %310 : vector<1x256xf32>
    %c54 = arith.constant 54 : index
    %312 = memref.load %arg2[%c54] : memref<96xf32, #tpu.memory_space<smem>>
    %313 = vector.broadcast %312 : f32 to vector<1x256xf32>
    %314 = arith.mulf %313, %11 : vector<1x256xf32>
    %315 = arith.addf %311, %314 : vector<1x256xf32>
    %c86 = arith.constant 86 : index
    %316 = memref.load %arg2[%c86] : memref<96xf32, #tpu.memory_space<smem>>
    %317 = vector.broadcast %316 : f32 to vector<1x256xf32>
    %318 = arith.mulf %317, %12 : vector<1x256xf32>
    %319 = arith.addf %315, %318 : vector<1x256xf32>
    %c23 = arith.constant 23 : index
    %320 = memref.load %arg2[%c23] : memref<96xf32, #tpu.memory_space<smem>>
    %321 = vector.broadcast %320 : f32 to vector<1x256xf32>
    %322 = arith.mulf %321, %14 : vector<1x256xf32>
    %323 = arith.addf %319, %322 : vector<1x256xf32>
    %c55 = arith.constant 55 : index
    %324 = memref.load %arg2[%c55] : memref<96xf32, #tpu.memory_space<smem>>
    %325 = vector.broadcast %324 : f32 to vector<1x256xf32>
    %326 = arith.mulf %325, %15 : vector<1x256xf32>
    %327 = arith.addf %323, %326 : vector<1x256xf32>
    %c87 = arith.constant 87 : index
    %328 = memref.load %arg2[%c87] : memref<96xf32, #tpu.memory_space<smem>>
    %329 = vector.broadcast %328 : f32 to vector<1x256xf32>
    %330 = arith.mulf %329, %16 : vector<1x256xf32>
    %331 = arith.addf %327, %330 : vector<1x256xf32>
    %c0_30 = arith.constant 0 : index
    %c5_31 = arith.constant 5 : index
    %c0_32 = arith.constant 0 : index
    %332 = vector.load %arg4[%c0_30, %c5_31, %c0_32] : memref<1x8x256xf32, #tpu.memory_space<vmem>>, vector<1x1x256xf32>
    %333 = vector.shape_cast %332 : vector<1x1x256xf32> to vector<1x256xf32>
    %334 = vector.shape_cast %331 : vector<1x256xf32> to vector<1x1x256xf32>
    tpu.vector_store %arg4[%c0_30, %c5_31, %c0_32], %334 {strides = array<i32>} : memref<1x8x256xf32, #tpu.memory_space<vmem>>, vector<1x1x256xf32>,
    %c6_33 = arith.constant 6 : index
    %335 = memref.load %arg3[%c6_33] : memref<8xf32, #tpu.memory_space<smem>>
    %c24 = arith.constant 24 : index
    %336 = memref.load %arg2[%c24] : memref<96xf32, #tpu.memory_space<smem>>
    %337 = vector.broadcast %336 : f32 to vector<1x256xf32>
    %338 = arith.mulf %337, %2 : vector<1x256xf32>
    %339 = vector.broadcast %335 : f32 to vector<1x256xf32>
    %340 = arith.addf %339, %338 : vector<1x256xf32>
    %c56 = arith.constant 56 : index
    %341 = memref.load %arg2[%c56] : memref<96xf32, #tpu.memory_space<smem>>
    %342 = vector.broadcast %341 : f32 to vector<1x256xf32>
    %343 = arith.mulf %342, %3 : vector<1x256xf32>
    %344 = arith.addf %340, %343 : vector<1x256xf32>
    %c88 = arith.constant 88 : index
    %345 = memref.load %arg2[%c88] : memref<96xf32, #tpu.memory_space<smem>>
    %346 = vector.broadcast %345 : f32 to vector<1x256xf32>
    %347 = arith.mulf %346, %4 : vector<1x256xf32>
    %348 = arith.addf %344, %347 : vector<1x256xf32>
    %c25 = arith.constant 25 : index
    %349 = memref.load %arg2[%c25] : memref<96xf32, #tpu.memory_space<smem>>
    %350 = vector.broadcast %349 : f32 to vector<1x256xf32>
    %351 = arith.mulf %350, %6 : vector<1x256xf32>
    %352 = arith.addf %348, %351 : vector<1x256xf32>
    %c57 = arith.constant 57 : index
    %353 = memref.load %arg2[%c57] : memref<96xf32, #tpu.memory_space<smem>>
    %354 = vector.broadcast %353 : f32 to vector<1x256xf32>
    %355 = arith.mulf %354, %7 : vector<1x256xf32>
    %356 = arith.addf %352, %355 : vector<1x256xf32>
    %c89 = arith.constant 89 : index
    %357 = memref.load %arg2[%c89] : memref<96xf32, #tpu.memory_space<smem>>
    %358 = vector.broadcast %357 : f32 to vector<1x256xf32>
    %359 = arith.mulf %358, %8 : vector<1x256xf32>
    %360 = arith.addf %356, %359 : vector<1x256xf32>
    %c26 = arith.constant 26 : index
    %361 = memref.load %arg2[%c26] : memref<96xf32, #tpu.memory_space<smem>>
    %362 = vector.broadcast %361 : f32 to vector<1x256xf32>
    %363 = arith.mulf %362, %10 : vector<1x256xf32>
    %364 = arith.addf %360, %363 : vector<1x256xf32>
    %c58 = arith.constant 58 : index
    %365 = memref.load %arg2[%c58] : memref<96xf32, #tpu.memory_space<smem>>
    %366 = vector.broadcast %365 : f32 to vector<1x256xf32>
    %367 = arith.mulf %366, %11 : vector<1x256xf32>
    %368 = arith.addf %364, %367 : vector<1x256xf32>
    %c90 = arith.constant 90 : index
    %369 = memref.load %arg2[%c90] : memref<96xf32, #tpu.memory_space<smem>>
    %370 = vector.broadcast %369 : f32 to vector<1x256xf32>
    %371 = arith.mulf %370, %12 : vector<1x256xf32>
    %372 = arith.addf %368, %371 : vector<1x256xf32>
    %c27 = arith.constant 27 : index
    %373 = memref.load %arg2[%c27] : memref<96xf32, #tpu.memory_space<smem>>
    %374 = vector.broadcast %373 : f32 to vector<1x256xf32>
    %375 = arith.mulf %374, %14 : vector<1x256xf32>
    %376 = arith.addf %372, %375 : vector<1x256xf32>
    %c59 = arith.constant 59 : index
    %377 = memref.load %arg2[%c59] : memref<96xf32, #tpu.memory_space<smem>>
    %378 = vector.broadcast %377 : f32 to vector<1x256xf32>
    %379 = arith.mulf %378, %15 : vector<1x256xf32>
    %380 = arith.addf %376, %379 : vector<1x256xf32>
    %c91 = arith.constant 91 : index
    %381 = memref.load %arg2[%c91] : memref<96xf32, #tpu.memory_space<smem>>
    %382 = vector.broadcast %381 : f32 to vector<1x256xf32>
    %383 = arith.mulf %382, %16 : vector<1x256xf32>
    %384 = arith.addf %380, %383 : vector<1x256xf32>
    %c0_34 = arith.constant 0 : index
    %c6_35 = arith.constant 6 : index
    %c0_36 = arith.constant 0 : index
    %385 = vector.load %arg4[%c0_34, %c6_35, %c0_36] : memref<1x8x256xf32, #tpu.memory_space<vmem>>, vector<1x1x256xf32>
    %386 = vector.shape_cast %385 : vector<1x1x256xf32> to vector<1x256xf32>
    %387 = vector.shape_cast %384 : vector<1x256xf32> to vector<1x1x256xf32>
    tpu.vector_store %arg4[%c0_34, %c6_35, %c0_36], %387 {strides = array<i32>} : memref<1x8x256xf32, #tpu.memory_space<vmem>>, vector<1x1x256xf32>,
    %c7_37 = arith.constant 7 : index
    %388 = memref.load %arg3[%c7_37] : memref<8xf32, #tpu.memory_space<smem>>
    %c28 = arith.constant 28 : index
    %389 = memref.load %arg2[%c28] : memref<96xf32, #tpu.memory_space<smem>>
    %390 = vector.broadcast %389 : f32 to vector<1x256xf32>
    %391 = arith.mulf %390, %2 : vector<1x256xf32>
    %392 = vector.broadcast %388 : f32 to vector<1x256xf32>
    %393 = arith.addf %392, %391 : vector<1x256xf32>
    %c60 = arith.constant 60 : index
    %394 = memref.load %arg2[%c60] : memref<96xf32, #tpu.memory_space<smem>>
    %395 = vector.broadcast %394 : f32 to vector<1x256xf32>
    %396 = arith.mulf %395, %3 : vector<1x256xf32>
    %397 = arith.addf %393, %396 : vector<1x256xf32>
    %c92 = arith.constant 92 : index
    %398 = memref.load %arg2[%c92] : memref<96xf32, #tpu.memory_space<smem>>
    %399 = vector.broadcast %398 : f32 to vector<1x256xf32>
    %400 = arith.mulf %399, %4 : vector<1x256xf32>
    %401 = arith.addf %397, %400 : vector<1x256xf32>
    %c29 = arith.constant 29 : index
    %402 = memref.load %arg2[%c29] : memref<96xf32, #tpu.memory_space<smem>>
    %403 = vector.broadcast %402 : f32 to vector<1x256xf32>
    %404 = arith.mulf %403, %6 : vector<1x256xf32>
    %405 = arith.addf %401, %404 : vector<1x256xf32>
    %c61 = arith.constant 61 : index
    %406 = memref.load %arg2[%c61] : memref<96xf32, #tpu.memory_space<smem>>
    %407 = vector.broadcast %406 : f32 to vector<1x256xf32>
    %408 = arith.mulf %407, %7 : vector<1x256xf32>
    %409 = arith.addf %405, %408 : vector<1x256xf32>
    %c93 = arith.constant 93 : index
    %410 = memref.load %arg2[%c93] : memref<96xf32, #tpu.memory_space<smem>>
    %411 = vector.broadcast %410 : f32 to vector<1x256xf32>
    %412 = arith.mulf %411, %8 : vector<1x256xf32>
    %413 = arith.addf %409, %412 : vector<1x256xf32>
    %c30 = arith.constant 30 : index
    %414 = memref.load %arg2[%c30] : memref<96xf32, #tpu.memory_space<smem>>
    %415 = vector.broadcast %414 : f32 to vector<1x256xf32>
    %416 = arith.mulf %415, %10 : vector<1x256xf32>
    %417 = arith.addf %413, %416 : vector<1x256xf32>
    %c62 = arith.constant 62 : index
    %418 = memref.load %arg2[%c62] : memref<96xf32, #tpu.memory_space<smem>>
    %419 = vector.broadcast %418 : f32 to vector<1x256xf32>
    %420 = arith.mulf %419, %11 : vector<1x256xf32>
    %421 = arith.addf %417, %420 : vector<1x256xf32>
    %c94 = arith.constant 94 : index
    %422 = memref.load %arg2[%c94] : memref<96xf32, #tpu.memory_space<smem>>
    %423 = vector.broadcast %422 : f32 to vector<1x256xf32>
    %424 = arith.mulf %423, %12 : vector<1x256xf32>
    %425 = arith.addf %421, %424 : vector<1x256xf32>
    %c31 = arith.constant 31 : index
    %426 = memref.load %arg2[%c31] : memref<96xf32, #tpu.memory_space<smem>>
    %427 = vector.broadcast %426 : f32 to vector<1x256xf32>
    %428 = arith.mulf %427, %14 : vector<1x256xf32>
    %429 = arith.addf %425, %428 : vector<1x256xf32>
    %c63 = arith.constant 63 : index
    %430 = memref.load %arg2[%c63] : memref<96xf32, #tpu.memory_space<smem>>
    %431 = vector.broadcast %430 : f32 to vector<1x256xf32>
    %432 = arith.mulf %431, %15 : vector<1x256xf32>
    %433 = arith.addf %429, %432 : vector<1x256xf32>
    %c95 = arith.constant 95 : index
    %434 = memref.load %arg2[%c95] : memref<96xf32, #tpu.memory_space<smem>>
    %435 = vector.broadcast %434 : f32 to vector<1x256xf32>
    %436 = arith.mulf %435, %16 : vector<1x256xf32>
    %437 = arith.addf %433, %436 : vector<1x256xf32>
    %c0_38 = arith.constant 0 : index
    %c7_39 = arith.constant 7 : index
    %c0_40 = arith.constant 0 : index
    %438 = vector.load %arg4[%c0_38, %c7_39, %c0_40] : memref<1x8x256xf32, #tpu.memory_space<vmem>>, vector<1x1x256xf32>
    %439 = vector.shape_cast %438 : vector<1x1x256xf32> to vector<1x256xf32>
    %440 = vector.shape_cast %437 : vector<1x256xf32> to vector<1x1x256xf32>
    tpu.vector_store %arg4[%c0_38, %c7_39, %c0_40], %440 {strides = array<i32>} : memref<1x8x256xf32, #tpu.memory_space<vmem>>, vector<1x1x256xf32>,
    return
  }
  func.func @transform_0(%arg0: i32) -> (i32, i32, i32) {
    %c0_i32 = arith.constant 0 : i32
    %c0_i32_0 = arith.constant 0 : i32
    %c0_i32_1 = arith.constant 0 : i32
    return %arg0, %c0_i32, %c0_i32_0 : i32, i32, i32
  }
  func.func @transform_1(%arg0: i32) -> i32 {
    %c0_i32 = arith.constant 0 : i32
    %c0_i32_0 = arith.constant 0 : i32
    return %c0_i32 : i32
  }
  func.func @transform_2(%arg0: i32) -> i32 {
    %c0_i32 = arith.constant 0 : i32
    %c0_i32_0 = arith.constant 0 : i32
    return %c0_i32 : i32
  }
  func.func @transform_3(%arg0: i32) -> (i32, i32, i32) {
    %c0_i32 = arith.constant 0 : i32
    %c0_i32_0 = arith.constant 0 : i32
    %c0_i32_1 = arith.constant 0 : i32
    return %arg0, %c0_i32, %c0_i32_0 : i32, i32, i32
  }
}

</mosaic_0001>

<bundles_post_ra>
// kernel: tpu_custom_call.1
= control target key start
LH: loop header
LB: loop body
LE: loop exit
PB: predicated region body
PF: predicated region fallthrough
CT: control target
= control target key end

     0   :  { %s3053_s0 = inlined_call_operand.hbm [shape: f32[2,4,256], index: 0, kind: input, shape index: {}]   ;;  %s3054_s1 = inlined_call_operand.vmem [shape: f32[96], index: 1, kind: input, shape index: {}]   ;;  %s3055_s2 = inlined_call_operand.vmem [shape: f32[8], index: 2, kind: input, shape index: {}]   ;;  %s3056_s3 = inlined_call_operand.hbm [shape: f32[2,8,256], index: 3, kind: output, shape index: {}]  }
   0x1   :  { %3126 = sst [smem:[#allocation72_spill]] %s3053_s0 }
   0x2   :  { %3127 = sst [smem:[#allocation73_spill]] %s3054_s1 }
   0x3   :  { %3128 = sst [smem:[#allocation74_spill]] %s3055_s2 }
   0x4   :  { %3129 = sst [smem:[#allocation75_spill]] %s3056_s3 }
   0x5   :  { %8 = vsyncpa [#allocation3], 0 }
   0x6   :  { %10 = vsyncpa [#allocation3 + $0x1], 0 }
   0x7   :  { %11 = vsyncpa [#allocation5], 0 }
   0x8   :  { %12 = vsyncpa [#allocation8], 0 }
   0x9   :  { %13 = vsyncpa [#allocation4], 0 }
   0xa   :  { %15 = vsyncpa [#allocation4 + $0x1], 0  ;;  %s1772_s12 = smov 0   ;;  %s1774_s13 = smov 0  }
   0xb   :  { %s1776_s14 = smov 0   ;;  %s1778_s15 = smov 0  }
   0xc LB: > { %3130 = sst [smem:[#allocation14_spill]] %s1731_s12  ;;  %s1793_s16 = sadd.s32 4294967295, %s1743_s15   ;;  %s1743_s15 = sphi %s1778_s15, %s3392_s15   ;;  %s1739_s14 = sphi %s1776_s14, %s3395_s14   ;;  %s1735_s13 = sphi %s1774_s13, %s3394_s13   ;;  %s1731_s12 = sphi %s1772_s12, %s3393_s12  }
   0xd   : > { %3131 = sst [smem:[#allocation15_spill]] %s1735_s13  ;;  %s1386_s17 = sadd.s32 4294967294, %s1743_s15  }
   0xe   : > { %3132 = sst [smem:[#allocation16_spill]] %s1739_s14  ;;  %p41_p0 = scmp.ne.s32.totalorder %s1735_s13, %s1731_s12 }
   0xf   : > { %3133 = sst [smem:[#allocation17_spill]] %s1743_s15  ;;  %p3057_p1 = scmp.eq.s32.totalorder %s1793_s16, 0 }
  0x10   : > { %3134 = sst [smem:[#allocation18_spill]] %s1793_s16  ;;  %p113_p3 = scmp.eq.s32.totalorder %s1386_s17, 1 }
  0x11   : > { %p1802_p4 = por %p3057_p1, %p41_p0  ;;  %p1387_p5 = scmp.ge.s32.totalorder %s1743_s15, 1 }
  0x12   : > { %p1807_p6 = por %p113_p3, %p41_p0  ;;  %p120_p7 = scmp.lt.s32.totalorder %s1743_s15, 3 }
  0x13   : > { %s3135_s18 = scalar_select %p1802_p4, 1, 0 }
  0x14   : > { %s3136_s19 = scalar_select %p1807_p6, 1, 0 }
  0x15   : > { %s3138_s1 = sld [smem:[#allocation73_spill]]  ;;  %p1815_p8 = pnand %p1387_p5, %p120_p7 }
  0x16   : > { %3137 = sst [smem:[#allocation19_spill]] %s3136_s19  ;;  %s3140_s2 = sld [smem:[#allocation74_spill]] }
  0x17   : > { %s3139_s23 = scalar_select %p1815_p8, 1, 0 }
  0x18   : > { %p1551_p10 = pneg %p1815_p8  ;;  %s1832_s28 = sadd.s32 1, %s1743_s15  }
  0x19   : > { %3142 = sst [smem:[#allocation20_spill]] %s1832_s28  ;;  %s25_s29 = ssub.s32 %s1743_s15, %s1832_s28 }
  0x1a   : > { %p1827_p11 = pnand %p1551_p10, %p3057_p1 }
  0x1b   : > { %s133_s22 = sshll.u32 %s3138_s1, 4  ;;  %s134_s22 = int_to_ptr.vmem [resolvable:$true] %s133_s22 }
  0x1c   : > { %s144_s26 = sshll.u32 %s3140_s2, 4  ;;  %s1609_s30 = scalar_lea.vmem %s134_s22, 16  ;;  %s145_s26 = int_to_ptr.vmem [resolvable:$true] %s144_s26 }
  0x1d   : > { %p1610_p12 = scmp.ne.s32.totalorder %s134_s22, %s1609_s30  ;;  %p1611_p13 = pneg %p1827_p11 }
  0x1e   : > { %p1617_p5 = scmp.lt.s32.totalorder %s134_s22, %s134_s22  ;;  %p1618_p7 = scmp.lt.s32.totalorder %s1609_s30, %s1609_s30 }
  0x1f   : > { %p1612_p0 = pnand %p1611_p13, %p1610_p12 }
  0x20   : > { %p1619_p9 = por %p1618_p7, %p1617_p5 }
  0x21   : > { %p1613_p3 = pneg %p1612_p0 }
  0x23   : > { %p1620_p2 = pnand %p1619_p9, %p1613_p3 }
  0x25   : > { %1623 = shalt.err (!%p1620_p2)
}
  0x26   : > { %s1745_s4 = smov [#allocation6]   ;;  %s1624_s5 = scalar_lea.vmem %s145_s26, 16 }
  0x27   : > { %1554 = dma.vmem_to_smem (!%p1827_p11), %s134_s22, 16, %s1745_s4, [#allocation5]  }
  0x28   : > { %p1625_p10 = scmp.ne.s32.totalorder %s145_s26, %s1624_s5  ;;  %p1632_p4 = scmp.lt.s32.totalorder %s145_s26, %s145_s26 }
  0x29   : > { %p1633_p8 = scmp.lt.s32.totalorder %s1624_s5, %s1624_s5 }
  0x2a   : > { %p1627_p1 = pnand %p1625_p10, %p1611_p13 }
  0x2b   : > { %p1634_p12 = por %p1633_p8, %p1632_p4 }
  0x2c   : > { %p1628_p6 = pneg %p1627_p1 }
  0x2e   : > { %p1635_p0 = pnand %p1634_p12, %p1628_p6 }
  0x30   : > { %1638 = shalt.err (!%p1635_p0)
}
  0x31   : > { %s1746_s6 = smov [#allocation7]   ;;  %p26_p2 = scmp.eq.s32.totalorder %s25_s29, 0 }
  0x32   : > { %1557 = dma.vmem_to_smem (!%p1827_p11), %s145_s26, 16, %s1746_s6, [#allocation8]  }
  0x33   : > { %s28_s7 = sadd.s32 1, %s1739_s14  ;;  %p35_p1 = scmp.ne.s32.totalorder %s1739_s14, %s1735_s13 }
  0x34   : > { %p36_p9 = scmp.eq.s32.totalorder %s1743_s15, 0  ;;  %p3144_p6 = scmp.eq.s32.totalorder %s1793_s16, 1 }
  0x35   : > { %s1847_s8 = scalar_select %p26_p2, %s1739_s14, %s28_s7  }
  0x36   : > { %p37_p4 = por %p36_p9, %p35_p1  ;;  %p1851_p8 = por %p3144_p6, %p35_p1 }
  0x37   : > { %3143 = sst [smem:[#allocation21_spill]] %s1847_s8  ;;  %p1568_p13 = scmp.lt.s32.totalorder %s1743_s15, 2 }
  0x38   : > { %s3145_s9 = scalar_select %p1851_p8, 1, 0 }
  0x39   : > { %s155_s10 = sand.u32 1, %s1739_s14   ;;  %s1537_s17 = sshll.u32 %s1743_s15, 7 }
  0x3a   : > { %3146 = sst [smem:[#allocation22_spill]] %s3145_s9  ;;  %s1391_s11 = sshll.u32 %s155_s10, 3 }
  0x3b   : > { %s3147_s0 = sld [smem:[#allocation72_spill]]  ;;  %s159_s24 = scalar_lea.vmem [#allocation2], %s1391_s11 }
  0x3c   : > { %s167_s25 = sshll.u32 %s159_s24, 4  ;;  %p1865_p11 = pnand %p1568_p13, %p37_p4  ;;  %s1863_s25 = int_to_ptr.vmem [resolvable:$true] %s167_s25 }
  0x3d   : > { %s156_s27 = scalar_lea.sflag [#allocation3], %s155_s10 }
  0x3e   : > { %p1641_p5 = pneg %p1865_p11 }
  0x41   : > { %s1861_s22 = scalar_lea.hbm %s3147_s0, %s1537_s17  ;;  %s1644_s5 = scalar_lea.hbm %s3147_s0, 256 }
  0x42   : > { %s1639_s29 = scalar_lea.hbm %s1861_s22, 128  ;;  %p1645_p12 = scmp.lt.u32.totalorder %s1861_s22, %s3147_s0 }
  0x43   : > { %p1640_p3 = scmp.ne.s32.totalorder %s1861_s22, %s1639_s29  ;;  %p1646_p0 = scmp.lt.u32.totalorder %s1644_s5, %s1639_s29 }
  0x44   : > { %p1648_p1 = scmp.lt.u32.totalorder %s1639_s29, %s1861_s22 }
  0x45   : > { %p1642_p7 = pnand %p1641_p5, %p1640_p3  ;;  %p1647_p2 = por %p1646_p0, %p1645_p12 }
  0x47   : > { %p1643_p10 = pneg %p1642_p7  ;;  %p1649_p9 = por %p1648_p1, %p1647_p2 }
  0x49   : > { %p1650_p4 = pnand %p1649_p9, %p1643_p10 }
  0x4b   : > { %1653 = shalt.err (!%p1650_p4)
}
  0x4c   : > { %s1654_s10 = scalar_lea.vmem %s1863_s25, 128  ;;  %s1747_s11 = smov [#allocation2]  }
  0x4d   : > { %p1655_p6 = scmp.ne.s32.totalorder %s1863_s25, %s1654_s10  ;;  %s1659_s17 = sshll.u32 %s1747_s11, 4  ;;  %s1660_s17 = int_to_ptr.vmem [resolvable:$false] %s1659_s17 }
  0x4e   : > { %s1661_s20 = scalar_lea.vmem %s1660_s17, 256  ;;  %p1662_p7 = scmp.lt.s32.totalorder %s1863_s25, %s1660_s17 }
  0x4f   : > { %p1657_p13 = pnand %p1655_p6, %p1641_p5  ;;  %p1663_p12 = scmp.lt.s32.totalorder %s1661_s20, %s1654_s10 }
  0x51   : > { %p1658_p3 = pneg %p1657_p13  ;;  %p1664_p0 = por %p1663_p12, %p1662_p7 }
  0x53   : > { %p1665_p2 = pnand %p1664_p0, %p1658_p3 }
  0x55   : > { %1668 = shalt.err (!%p1665_p2)
}
  0x56   : > { %1561 = dma.hbm_to_vmem [thread:$0]  (!%p1865_p11), %s1861_s22, 128, %s1863_s25, %s156_s27  }
  0x57   : > { %p3149_p10 = scmp.ne.s32.totalorder %s3139_s23, 0 }
  0x59   : > { %176 = sbr.rel (%p3149_p10) target bundleno = 449 (0x1c1), region = 32 }
  0x60   : > { %s1897_s21 = sand.u32 1, %s1735_s13   ;;  %p3151_p5 = scmp.ne.s32.totalorder %s3135_s18, 0 }
  0x61   : > { %3150 = sst [smem:[#allocation23_spill]] %s1897_s21  ;;  %s1395_s24 = sshll.u32 %s1897_s21, 3 }
  0x62   : > { %s179_s29 = scalar_lea.sflag [#allocation3], %s1897_s21  ;;  %s182_s30 = scalar_lea.vmem [#allocation2], %s1395_s24 }
  0x63   : > { %1714 = dma.done.wait (%p3151_p5), %s179_s29, 128  }
  0x64   : > { %1716 = vsyncadd (%p3151_p5), %s179_s29, 4294967168  ;;  %p3152_p1 = scmp.eq.s32.totalorder %s1793_s16, 0 }
  0x66   : > { %1718 = dma.done.wait (%p3152_p1), [#allocation5], 16   ;;  %p3153_p11 = pmov %p3152_p1 }
  0x67   : > { %p3154_p9 = pmov %p3152_p1 }
  0x68   : > { %1720 = vsyncadd (%p3153_p11), [#allocation5], 4294967280 }
  0x69   : > { %1722 = dma.done.wait (%p3154_p9), [#allocation8], 16   ;;  %p3155_p4 = pmov %p3152_p1 }
  0x6b   : > { %1724 = vsyncadd (%p3155_p4), [#allocation8], 4294967280 }
  0x6c   : > { %195 = sfence }
  0x6d   : > { %v3074_v0 = vlaneseq  ;;  %v1916_v2 = vld [vmem:[%s182_s30] sm:$0xff]  ;;  %s1748_s18 = smov 112   ;;  %s1934_s23 = sld [smem:[#allocation6 + $0x20]] }
  0x6e   : > { %s1936_s22 = sld [smem:[#allocation6 + $0x24]]  ;;  %s1938_s25 = sld [smem:[#allocation6 + $0x28]] }
  0x6f   : > { %v1914_v1 = vshrl.u32 %v3074_v0, 7  ;;  %s1940_s26 = sld [smem:[#allocation6 + $0x2c]]  ;;  %s1942_s27 = sld [smem:[#allocation6 + $0x30]]  ;;  %v1979_v19 = vand.u32 127, %v3074_v0 }
  0x70   : > { %s1944_s4 = sld [smem:[#allocation6 + $0x34]]  ;;  %s1946_s5 = sld [smem:[#allocation6 + $0x38]] }
  0x71   : > { %v218_v3 = vsub.s32 0, %v1914_v1  ;;  %v244_v4 = vsub.s32 1, %v1914_v1  ;;  %v222_v5 = vsub.s32 4, %v1914_v1  ;;  %v248_v6 = vsub.s32 5, %v1914_v1  ;;  %s1948_s6 = sld [smem:[#allocation6 + $0x3c]]  ;;  %s1950_s7 = sld [smem:[#allocation6 + $0x21]] }
  0x72   : > { %v270_v11 = vsub.s32 6, %v1914_v1  ;;  %v266_v12 = vsub.s32 2, %v1914_v1  ;;  %v292_v15 = vsub.s32 7, %v1914_v1  ;;  %v288_v16 = vsub.s32 3, %v1914_v1  ;;  %s1952_s10 = sld [smem:[#allocation6 + $0x25]]  ;;  %s1954_s11 = sld [smem:[#allocation6 + $0x29]] }
  0x73   : > { %v219_v7 = vrot.slane %v1916_v2, %v218_v3  ;;  %v245_v8 = vrot.slane %v1916_v2, %v244_v4  ;;  %v223_v9 = vrot.slane %v1916_v2, %v222_v5  ;;  %v249_v10 = vrot.slane %v1916_v2, %v248_v6  ;;  %s1956_s17 = sld [smem:[#allocation6 + $0x2d]]  ;;  %s1958_s20 = sld [smem:[#allocation6 + $0x31]] }
  0x74   : > { %v271_v13 = vrot.slane %v1916_v2, %v270_v11  ;;  %v267_v14 = vrot.slane %v1916_v2, %v266_v12  ;;  %v293_v17 = vrot.slane %v1916_v2, %v292_v15  ;;  %v289_v18 = vrot.slane %v1916_v2, %v288_v16  ;;  %s1960_s24 = sld [smem:[#allocation6 + $0x35]]  ;;  %s1962_s29 = sld [smem:[#allocation6 + $0x39]] }
  0x75   : > { %226 = vrot.lane.b32.xlu0 %v219_v7, %s1748_s18  ;;  %252 = vrot.lane.b32.xlu1 %v245_v8, %s1748_s18  ;;  %s1964_s30 = sld [smem:[#allocation6 + $0x3d]]  ;;  %s1968_s0 = sld [smem:[#allocation6 + $0x26]]  ;;  %vm232_vm0 = vcmp.lt.s32.totalorder %v1979_v19, 112  ;;  %v315_v20 = vstv %s1934_s23  ;;  %v439_v21 = vstv %s1936_s22  ;;  %vm239_vm1 = vcmp.lt.s32.totalorder %v1979_v19, 127 }
  0x76   : > { %s1970_s1 = sld [smem:[#allocation6 + $0x2a]]  ;;  %s1972_s2 = sld [smem:[#allocation6 + $0x2e]]  ;;  %v560_v22 = vstv %s1938_s25  ;;  %v681_v23 = vstv %s1940_s26  ;;  %v802_v24 = vstv %s1942_s27  ;;  %v923_v25 = vstv %s1944_s4 }
  0x77   : > { %s1974_s8 = sld [smem:[#allocation6 + $0x32]]  ;;  %s1976_s14 = sld [smem:[#allocation6 + $0x36]]  ;;  %v1044_v26 = vstv %s1946_s5  ;;  %v1165_v27 = vstv %s1948_s6  ;;  %v341_v28 = vstv %s1950_s7 }
  0x78   : > { %s1981_s13 = sld [smem:[#allocation6 + $0x3a]]  ;;  %s1983_s28 = sld [smem:[#allocation6 + $0x3e]]  ;;  %v465_v29 = vstv %s1952_s10  ;;  %v586_v30 = vstv %s1954_s11 }
  0x79   : > { %228 = vrot.lane.b32.xlu0 %v223_v9, %s1748_s18  ;;  %254 = vrot.lane.b32.xlu1 %v249_v10, %s1748_s18  ;;  %s1985_s15 = sld [smem:[#allocation6 + $0x23]]  ;;  %s1987_s19 = sld [smem:[#allocation6 + $0x27]]  ;;  %v707_v31 = vstv %s1956_s17  ;;  %v828_v34 = vstv %s1958_s20 }
  0x7a   : > { %s1989_s12 = sld [smem:[#allocation6 + $0x2b]]  ;;  %s1991_s3 = sld [smem:[#allocation6 + $0x2f]]  ;;  %v949_v35 = vstv %s1960_s24  ;;  %v1070_v36 = vstv %s1962_s29 }
  0x7b   : > { %s1993_s9 = sld [smem:[#allocation6 + $0x33]]  ;;  %s1995_s16 = sld [smem:[#allocation6 + $0x37]]  ;;  %v1191_v37 = vstv %s1964_s30  ;;  %v491_v39 = vstv %s1968_s0 }
  0x7c   : > { %s1998_s21 = sld [smem:[#allocation6 + $0x3b]]  ;;  %v612_v40 = vstv %s1970_s1  ;;  %v733_v41 = vstv %s1972_s2  ;;  %s1749_s22 = smov 127  }
  0x7d   : > { %276 = vrot.lane.b32.xlu1 %v271_v13, %s1748_s18  ;;  %274 = vrot.lane.b32.xlu0 %v267_v14, %s1748_s18  ;;  %v854_v42 = vstv %s1974_s8  ;;  %v975_v43 = vstv %s1976_s14  ;;  %s2338_s0 = sld [smem:[#allocation7]]  ;;  %s2340_s2 = sld [smem:[#allocation7 + $0x1]] }
  0x7e   : > { %v1096_v44 = vstv %s1981_s13  ;;  %v1217_v45 = vstv %s1983_s28  ;;  %s309_s1 = sld [smem:[#allocation6]]  ;;  %s2348_s14 = sld [smem:[#allocation7 + $0x3]] }
  0x7f   : > { %3156 = sst [smem:[#allocation24_spill]] %s1985_s15  ;;  %s2000_s15 = sld [smem:[#allocation6 + $0x3f]]  ;;  %v517_v47 = vstv %s1987_s19 }
  0x80   : > { %s3157_s23 = sld [smem:[#allocation24_spill]]  ;;  %v638_v48 = vstv %s1989_s12  ;;  %v759_v49 = vstv %s1991_s3  ;;  %s2342_s3 = sld [smem:[#allocation6 + $0x4]] }
  0x81   : > { %298 = vrot.lane.b32.xlu1 %v293_v17, %s1748_s18  ;;  %296 = vrot.lane.b32.xlu0 %v289_v18, %s1748_s18  ;;  %s1966_s18 = sld [smem:[#allocation6 + $0x22]]  ;;  %s2346_s13 = sld [smem:[#allocation6 + $0x8]] }
  0x82   : > { %s2344_s12 = sld [smem:[#allocation7 + $0x2]]  ;;  %s2354_s19 = sld [smem:[#allocation6 + $0x14]] }
  0x83   : > { %s2356_s28 = sld [smem:[#allocation6 + $0x18]]  ;;  %s2358_s8 = sld [smem:[#allocation6 + $0x1c]] }
  0x84   : > { %s2364_s25 = sld [smem:[#allocation6 + $0x1]]  ;;  %s2366_s26 = sld [smem:[#allocation6 + $0x5]] }
  0x85   : > { %s2368_s27 = sld [smem:[#allocation6 + $0x9]]  ;;  %s2370_s4 = sld [smem:[#allocation6 + $0xd]] }
  0x86   : > { %v393_v46 = vstv %s3157_s23  ;;  %s2372_s5 = sld [smem:[#allocation7 + $0x6]]  ;;  %s2374_s6 = sld [smem:[#allocation7 + $0x7]] }
  0x87   : > { %v367_v38 = vstv %s1966_s18  ;;  %s2381_s7 = sld [smem:[#allocation6 + $0x40]]  ;;  %s2387_s10 = sld [smem:[#allocation6 + $0x44]] }
  0x88   : > { %s2390_s11 = sld [smem:[#allocation6 + $0x11]]  ;;  %s2395_s17 = sld [smem:[#allocation6 + $0x48]] }
  0x89   : > { %s2397_s20 = sld [smem:[#allocation6 + $0x15]]  ;;  %s2404_s24 = sld [smem:[#allocation6 + $0x4c]] }
  0x8a   : > { %s2407_s29 = sld [smem:[#allocation6 + $0x50]]  ;;  %s2413_s30 = sld [smem:[#allocation6 + $0x54]] }
  0x8b   : > { %s2418_s18 = sld [smem:[#allocation6 + $0x58]]  ;;  %s2420_s23 = sld [smem:[#allocation6 + $0x19]] }
  0xe7   : > { %v227_v32 = vpop.permute.xlu0 %226  ;;  %v253_v33 = vpop.permute.xlu1 %252 }
  0xeb   : > { %v229_v50 = vpop.permute.xlu0 %228  ;;  %v255_v51 = vpop.permute.xlu1 %254 }
  0xec   : > { %v233_v56 = vsel %vm232_vm0, %v227_v32, %v229_v50  ;;  %v234_v57 = vsel %vm232_vm0, %v229_v50, %v227_v32  ;;  %v256_v58 = vsel %vm232_vm0, %v253_v33, %v255_v51  ;;  %v257_v59 = vsel %vm232_vm0, %v255_v51, %v253_v33 }
  0xed   : > { %v2042_v60 = vmul.f32 %v315_v20, %v233_v56  ;;  %v2044_v61 = vmul.f32 %v315_v20, %v234_v57  ;;  %v2046_v62 = vmul.f32 %v439_v21, %v233_v56  ;;  %v2048_v63 = vmul.f32 %v439_v21, %v234_v57  ;;  %237 = vrot.lane.b32.xlu1 %v234_v57, %s1749_s22 }
  0xee   : > { %v2051_v3 = vmul.f32 %v560_v22, %v233_v56  ;;  %v2053_v4 = vmul.f32 %v560_v22, %v234_v57  ;;  %v2055_v5 = vmul.f32 %v681_v23, %v233_v56  ;;  %v2057_v6 = vmul.f32 %v681_v23, %v234_v57  ;;  %235 = vrot.lane.b32.xlu0 %v233_v56, %s1749_s22 }
  0xef   : > { %v2064_v9 = vmul.f32 %v802_v24, %v233_v56  ;;  %v2066_v10 = vmul.f32 %v802_v24, %v234_v57  ;;  %v2072_v13 = vmul.f32 %v923_v25, %v233_v56  ;;  %v2074_v14 = vmul.f32 %v923_v25, %v234_v57  ;;  %v277_v0 = vpop.permute.xlu1 %276 }
  0xf0   : > { %v2078_v16 = vmul.f32 %v1044_v26, %v233_v56  ;;  %v2080_v17 = vmul.f32 %v1044_v26, %v234_v57  ;;  %v2082_v18 = vmul.f32 %v1165_v27, %v233_v56  ;;  %v2087_v21 = vmul.f32 %v1165_v27, %v234_v57 }
  0xf1   : > { %260 = vrot.lane.b32.xlu1 %v257_v59, %s1749_s22  ;;  %v2089_v22 = vmul.f32 %v341_v28, %v256_v58  ;;  %v2091_v23 = vmul.f32 %v341_v28, %v257_v59  ;;  %v2096_v25 = vmul.f32 %v465_v29, %v256_v58  ;;  %v2098_v26 = vmul.f32 %v465_v29, %v257_v59 }
  0xf2   : > { %258 = vrot.lane.b32.xlu0 %v256_v58, %s1749_s22  ;;  %v2102_v32 = vmul.f32 %v586_v30, %v256_v58  ;;  %v2110_v33 = vmul.f32 %v586_v30, %v257_v59  ;;  %v2114_v50 = vmul.f32 %v707_v31, %v256_v58  ;;  %v2120_v51 = vmul.f32 %v707_v31, %v257_v59  ;;  %v275_v30 = vpop.permute.xlu0 %274 }
  0xf3   : > { %v2124_v56 = vmul.f32 %v828_v34, %v256_v58  ;;  %v2128_v57 = vmul.f32 %v828_v34, %v257_v59  ;;  %v2134_v27 = vmul.f32 %v949_v35, %v256_v58  ;;  %v2138_v31 = vmul.f32 %v949_v35, %v257_v59  ;;  %v299_v11 = vpop.permute.xlu1 %298 }
  0xf4   : > { %v2142_v29 = vmul.f32 %v1070_v36, %v256_v58  ;;  %v2150_v28 = vmul.f32 %v1070_v36, %v257_v59  ;;  %v2154_v20 = vmul.f32 %v1191_v37, %v256_v58  ;;  %v2160_v15 = vmul.f32 %v1191_v37, %v257_v59 }
  0xf5   : > { %v278_v34 = vsel %vm232_vm0, %v275_v30, %v277_v0  ;;  %v279_v24 = vsel %vm232_vm0, %v277_v0, %v275_v30 }
  0xf6   : > { %v2170_v58 = vmul.f32 %v367_v38, %v278_v34  ;;  %v2174_v12 = vmul.f32 %v367_v38, %v279_v24  ;;  %v2178_v37 = vmul.f32 %v491_v39, %v278_v34  ;;  %282 = vrot.lane.b32.xlu1 %v279_v24, %s1749_s22  ;;  %v2185_v0 = vmul.f32 %v491_v39, %v279_v24  ;;  %v297_v8 = vpop.permute.xlu0 %296 }
  0xf7   : > { %v2189_v30 = vmul.f32 %v612_v40, %v278_v34  ;;  %v2193_v38 = vmul.f32 %v612_v40, %v279_v24  ;;  %280 = vrot.lane.b32.xlu0 %v278_v34, %s1749_s22  ;;  %v2200_v59 = vmul.f32 %v733_v41, %v278_v34  ;;  %v2204_v39 = vmul.f32 %v733_v41, %v279_v24 }
  0xf8   : > { %3158 = vst [vmem:[#allocation25_spill] sm:$0xff] %v2170_v58  ;;  %3159 = vst [vmem:[#allocation26_spill] sm:$0xff] %v2174_v12  ;;  %v2208_v35 = vmul.f32 %v854_v42, %v278_v34  ;;  %v2216_v36 = vmul.f32 %v854_v42, %v279_v24  ;;  %v2220_v55 = vmul.f32 %v975_v43, %v278_v34 }
  0xf9   : > { %3160 = vst [vmem:[#allocation27_spill] sm:$0xff] %v2178_v37  ;;  %3161 = vst [vmem:[#allocation28_spill] sm:$0xff] %v2185_v0  ;;  %v2226_v54 = vmul.f32 %v975_v43, %v279_v24  ;;  %v2230_v40 = vmul.f32 %v1096_v44, %v278_v34  ;;  %v2234_v7 = vmul.f32 %v1096_v44, %v279_v24 }
  0xfa   : > { %3162 = vst [vmem:[#allocation29_spill] sm:$0xff] %v2189_v30  ;;  %3163 = vst [vmem:[#allocation30_spill] sm:$0xff] %v2193_v38  ;;  %v2240_v53 = vmul.f32 %v1217_v45, %v278_v34  ;;  %v2244_v41 = vmul.f32 %v1217_v45, %v279_v24  ;;  %v300_v43 = vsel %vm232_vm0, %v297_v8, %v299_v11  ;;  %v1162_v38 = vstv %s2374_s6  ;;  %s2537_s6 = sld [smem:[#allocation6 + $0xb]] }
  0xfb   : > { %3164 = vst [vmem:[#allocation31_spill] sm:$0xff] %v2200_v59  ;;  %3165 = vst [vmem:[#allocation32_spill] sm:$0xff] %v2204_v39  ;;  %v301_v42 = vsel %vm232_vm0, %v299_v11, %v297_v8  ;;  %v2256_v34 = vmul.f32 %v393_v46, %v300_v43  ;;  %302 = vrot.lane.b32.xlu0 %v300_v43, %s1749_s22  ;;  %v2267_v52 = vmul.f32 %v517_v47, %v300_v43 }
  0xfc   : > { %3166 = vst [vmem:[#allocation33_spill] sm:$0xff] %v2208_v35  ;;  %3167 = vst [vmem:[#allocation34_spill] sm:$0xff] %v2216_v36  ;;  %v2263_v24 = vmul.f32 %v393_v46, %v301_v42  ;;  %v2271_v44 = vmul.f32 %v517_v47, %v301_v42  ;;  %304 = vrot.lane.b32.xlu1 %v301_v42, %s1749_s22  ;;  %v2276_v8 = vmul.f32 %v638_v48, %v300_v43  ;;  %s2426_s22 = sld [smem:[#allocation6 + $0x1d]] }
  0xfd   : > { %3168 = vst [vmem:[#allocation35_spill] sm:$0xff] %v2220_v55  ;;  %3169 = vst [vmem:[#allocation36_spill] sm:$0xff] %v2226_v54  ;;  %v2280_v11 = vmul.f32 %v638_v48, %v301_v42  ;;  %v2284_v46 = vmul.f32 %v759_v49, %v300_v43  ;;  %v2288_v45 = vmul.f32 %v759_v49, %v301_v42  ;;  %v3186_v49 = vstv %s1995_s16  ;;  %s2352_s16 = sld [smem:[#allocation6 + $0x10]] }
  0xfe   : > { %3170 = vst [vmem:[#allocation37_spill] sm:$0xff] %v2230_v40  ;;  %3171 = vst [vmem:[#allocation38_spill] sm:$0xff] %v2234_v7  ;;  %v2308_v36 = vmul.f32 %v3186_v49, %v300_v43  ;;  %v3188_v35 = vmov %v3186_v49  ;;  %v436_v55 = vstv %s2340_s2  ;;  %v1041_v59 = vstv %s2372_s5  ;;  %s2438_s2 = sld [smem:[#allocation6 + $0xa]]  ;;  %s2535_s5 = sld [smem:[#allocation6 + $0x7]] }
  0xff   : > { %3172 = vst [vmem:[#allocation39_spill] sm:$0xff] %v2240_v53  ;;  %3173 = vst [vmem:[#allocation40_spill] sm:$0xff] %v2244_v41  ;;  %v3182_v53 = vstv %s1993_s9  ;;  %v2312_v47 = vmul.f32 %v3188_v35, %v301_v42  ;;  %s2360_s9 = sld [smem:[#allocation7 + $0x4]] }
 0x100   : > { %3174 = vst [vmem:[#allocation41_spill] sm:$0xff] %v2256_v34  ;;  %3175 = vst [vmem:[#allocation42_spill] sm:$0xff] %v2263_v24  ;;  %v2296_v7 = vmul.f32 %v3182_v53, %v300_v43  ;;  %v3184_v40 = vmov %v3182_v53  ;;  %v3190_v53 = vstv %s1998_s21  ;;  %v3194_v24 = vstv %s2000_s15  ;;  %s2350_s15 = sld [smem:[#allocation6 + $0xc]]  ;;  %s2362_s21 = sld [smem:[#allocation7 + $0x5]] }
 0x101   : > { %3176 = vst [vmem:[#allocation43_spill] sm:$0xff] %v2267_v52  ;;  %3177 = vst [vmem:[#allocation44_spill] sm:$0xff] %v2271_v44  ;;  %v2300_v54 = vmul.f32 %v3184_v40, %v301_v42  ;;  %v2318_v44 = vmul.f32 %v3190_v53, %v300_v43  ;;  %v3192_v40 = vmov %v3190_v53  ;;  %v2326_v48 = vmul.f32 %v3194_v24, %v300_v43 }
 0x102   : > { %3178 = vst [vmem:[#allocation45_spill] sm:$0xff] %v2276_v8  ;;  %3179 = vst [vmem:[#allocation46_spill] sm:$0xff] %v2280_v11  ;;  %v2322_v52 = vmul.f32 %v3192_v40, %v301_v42  ;;  %v3196_v49 = vmov %v3194_v24  ;;  %v1750_v43 = vmov 1966171168   ;;  %v310_v53 = vstv %s309_s1  ;;  %s2436_s1 = sld [smem:[#allocation6 + $0x6]] }
 0x103   : > { %3180 = vst [vmem:[#allocation47_spill] sm:$0xff] %v2284_v46  ;;  %3181 = vst [vmem:[#allocation48_spill] sm:$0xff] %v2288_v45  ;;  %v2332_v45 = vmul.f32 %v3196_v49, %v301_v42  ;;  %v412_v42 = vunpack.c.l.s4 %v1750_v43  ;;  %v434_v40 = vstv %s2342_s3  ;;  %v312_v43 = vstv %s2338_s0  ;;  %s2428_s0 = sld [smem:[#allocation6 + $0x2]]  ;;  %s2446_s3 = sld [smem:[#allocation6 + $0xe]] }
 0x104   : > { %3183 = vst [vmem:[#allocation49_spill] sm:$0xff] %v2296_v7  ;;  %3185 = vst [vmem:[#allocation50_spill] sm:$0xff] %v2300_v54  ;;  %v311_v35 = vmul.f32 %v310_v53, %v1916_v2  ;;  %v1039_v53 = vstv %s2356_s28  ;;  %v457_v54 = vstv %s2366_s26  ;;  %v699_v11 = vstv %s2370_s4  ;;  %s2475_s28 = sld [smem:[#allocation6 + $0x51]]  ;;  %s2507_s26 = sld [smem:[#allocation6 + $0x1e]] }
 0x105   : > { %3187 = vst [vmem:[#allocation51_spill] sm:$0xff] %v2308_v36  ;;  %3189 = vst [vmem:[#allocation52_spill] sm:$0xff] %v2312_v47  ;;  %v413_v24 = vunpack.c.0.s8 %v412_v42  ;;  %v555_v42 = vstv %s2346_s13  ;;  %v678_v47 = vstv %s2348_s14  ;;  %v799_v36 = vstv %s2360_s9  ;;  %s2451_s13 = sld [smem:[#allocation6 + $0x41]]  ;;  %s2457_s14 = sld [smem:[#allocation6 + $0x45]] }
 0x106   : > { %3191 = vst [vmem:[#allocation53_spill] sm:$0xff] %v2318_v44  ;;  %3193 = vst [vmem:[#allocation54_spill] sm:$0xff] %v2322_v52  ;;  %v676_v41 = vstv %s2350_s15  ;;  %v556_v52 = vmul.f32 %v555_v42, %v1916_v2  ;;  %v578_v42 = vstv %s2368_s27  ;;  %v313_v34 = vadd.f32 %v312_v43, %v311_v35  ;;  %s2459_s15 = sld [smem:[#allocation6 + $0x12]]  ;;  %s2489_s9 = sld [smem:[#allocation6 + $0x55]] }
 0x107   : > { %3195 = vst [vmem:[#allocation55_spill] sm:$0xff] %v2326_v48  ;;  %3197 = vst [vmem:[#allocation56_spill] sm:$0xff] %v2332_v45  ;;  %v2378_v49 = vsub.s32 %v413_v24, %v1914_v1  ;;  %v797_v45 = vstv %s2352_s16  ;;  %v918_v1 = vstv %s2354_s19  ;;  %v435_v24 = vmul.f32 %v434_v40, %v1916_v2  ;;  %s2465_s16 = sld [smem:[#allocation6 + $0x49]]  ;;  %s2467_s19 = sld [smem:[#allocation6 + $0x4d]] }
 0x108   : > { %v1160_v48 = vstv %s2358_s8  ;;  %v677_v44 = vmul.f32 %v676_v41, %v1916_v2  ;;  %v333_v40 = vstv %s2364_s25  ;;  %v798_v7 = vmul.f32 %v797_v45, %v1916_v2  ;;  %s2477_s8 = sld [smem:[#allocation6 + $0x16]]  ;;  %s2505_s25 = sld [smem:[#allocation6 + $0x59]] }
 0x109   : > { %3198 = vst [vmem:[#allocation57_spill] sm:$0xff] %v2378_v49  ;;  %v557_v49 = vstv %s2344_s12  ;;  %v919_v46 = vmul.f32 %v918_v1, %v1916_v2  ;;  %v1040_v41 = vmul.f32 %v1039_v53, %v1916_v2  ;;  %v1161_v8 = vmul.f32 %v1160_v48, %v1916_v2  ;;  %s2449_s12 = sld [smem:[#allocation6 + $0x5c]]  ;;  %s2521_s27 = sld [smem:[#allocation6 + $0x5d]] }
 0x10a   : > { %v920_v39 = vstv %s2362_s21  ;;  %v2431_v45 = vmul.f32 %v333_v40, %v1916_v2  ;;  %v437_v1 = vadd.f32 %v436_v55, %v435_v24  ;;  %v2434_v53 = vmul.f32 %v457_v54, %v1916_v2  ;;  %s2491_s21 = sld [smem:[#allocation6 + $0x1a]]  ;;  %s2523_s4 = sld [smem:[#allocation6 + $0x3]] }
 0x10b   : > { %v558_v30 = vadd.f32 %v557_v49, %v556_v52  ;;  %v2441_v48 = vmul.f32 %v578_v42, %v1916_v2  ;;  %v679_v35 = vadd.f32 %v678_v47, %v677_v44  ;;  %v2444_v43 = vmul.f32 %v699_v11, %v1916_v2 }
 0x10c   : > { %v800_v55 = vadd.f32 %v799_v36, %v798_v7  ;;  %v820_v54 = vstv %s2390_s11  ;;  %v921_v52 = vadd.f32 %v920_v39, %v919_v46  ;;  %v1042_v49 = vadd.f32 %v1041_v59, %v1040_v41  ;;  %3201 = sst [smem:[#allocation58_spill]] %s2489_s9  ;;  %s2551_s11 = sld [smem:[#allocation6 + $0xf]]  ;;  %v3358_v19 = vld [vmem:[#allocation51_spill] sm:$0xff] }
 0x10d   : > { %v1163_v24 = vadd.f32 %v1162_v38, %v1161_v8  ;;  %v941_v47 = vstv %s2397_s20  ;;  %3199 = sst [smem:[#allocation24_spill]] %s2467_s19  ;;  %v2472_v11 = vmul.f32 %v820_v54, %v1916_v2  ;;  %v3200_v41 = vcombine.low %v2042_v60, %v2044_v61  ;;  %s2553_s20 = sld [smem:[#allocation6 + $0x13]] }
 0x10e   : > { %v2485_v7 = vmul.f32 %v941_v47, %v1916_v2  ;;  %v1062_v8 = vstv %s2420_s23  ;;  %v3202_v54 = vcombine.low %v2046_v62, %v2048_v63  ;;  %v3203_v60 = vcombine.low %v2051_v3, %v2053_v4  ;;  %3204 = sst [smem:[#allocation59_spill]] %s2505_s25  ;;  %s2567_s23 = sld [smem:[#allocation6 + $0x17]] }
 0x10f   : > { %v2482_v36 = vadd.f32 %v3200_v41, %v313_v34  ;;  %v1183_v34 = vstv %s2426_s22  ;;  %v359_v47 = vstv %s2428_s0  ;;  %v3205_v41 = vcombine.low %v2055_v5, %v2057_v6  ;;  %s2569_s22 = sld [smem:[#allocation6 + $0x1b]]  ;;  %s2577_s0 = sld [smem:[#allocation6 + $0x1f]] }
 0x110   : > { %v2496_v46 = vadd.f32 %v3202_v54, %v437_v1  ;;  %v2501_v61 = vadd.f32 %v3203_v60, %v558_v30  ;;  %v3206_v62 = vcombine.low %v2064_v9, %v2066_v10  ;;  %v483_v1 = vstv %s2436_s1  ;;  %s2583_s1 = sld [smem:[#allocation6 + $0x42]]  ;;  %s2622_s9 = sld [smem:[#allocation6 + $0x43]] }
 0x111   : > { %v2512_v39 = vadd.f32 %v3205_v41, %v679_v35  ;;  %v604_v3 = vstv %s2438_s2  ;;  %v3207_v30 = vcombine.low %v2072_v13, %v2074_v14  ;;  %v2532_v6 = vmul.f32 %v1062_v8, %v1916_v2  ;;  %s2591_s2 = sld [smem:[#allocation6 + $0x46]]  ;;  %s2611_s19 = sld [smem:[#allocation6 + $0x5a]] }
 0x112   : > { %v2517_v63 = vadd.f32 %v3206_v62, %v800_v55  ;;  %v725_v9 = vstv %s2446_s3  ;;  %v3208_v35 = vcombine.low %v2078_v16, %v2080_v17  ;;  %v2546_v13 = vmul.f32 %v1183_v34, %v1916_v2  ;;  %s2593_s3 = sld [smem:[#allocation6 + $0x4a]]  ;;  %s2632_s25 = sld [smem:[#allocation6 + $0x4b]] }
 0x113   : > { %v2529_v5 = vadd.f32 %v3207_v30, %v921_v52  ;;  %v2549_v14 = vmul.f32 %v359_v47, %v1916_v2  ;;  %v3209_v52 = vcombine.low %v2082_v18, %v2087_v21  ;;  %v2561_v16 = vmul.f32 %v483_v1, %v1916_v2 }
 0x114   : > { %v2543_v55 = vadd.f32 %v3208_v35, %v1042_v49  ;;  %v2564_v17 = vmul.f32 %v604_v3, %v1916_v2  ;;  %v846_v49 = vstv %s2459_s15  ;;  %v2575_v18 = vmul.f32 %v725_v9, %v1916_v2  ;;  %s2599_s15 = sld [smem:[#allocation6 + $0x4e]] }
 0x115   : > { %v2558_v8 = vadd.f32 %v3209_v52, %v1163_v24  ;;  %v967_v41 = vstv %s2477_s8  ;;  %v2588_v3 = vmul.f32 %v846_v49, %v1916_v2  ;;  %v1088_v30 = vstv %s2491_s21  ;;  %s2601_s8 = sld [smem:[#allocation6 + $0x52]]  ;;  %s2609_s21 = sld [smem:[#allocation6 + $0x56]] }
 0x116   : > { %v1209_v47 = vstv %s2507_s26  ;;  %v2606_v62 = vmul.f32 %v967_v41, %v1916_v2  ;;  %v385_v24 = vstv %s2523_s4  ;;  %v2616_v9 = vmul.f32 %v1088_v30, %v1916_v2  ;;  %s2620_s26 = sld [smem:[#allocation6 + $0x5e]]  ;;  %s2630_s4 = sld [smem:[#allocation6 + $0x47]] }
 0x117   : > { %3210 = vst [vmem:[#allocation60_spill] sm:$0xff] %v2588_v3  ;;  %v509_v49 = vstv %s2535_s5  ;;  %v630_v52 = vstv %s2537_s6  ;;  %v2626_v1 = vmul.f32 %v1209_v47, %v1916_v2  ;;  %v751_v34 = vstv %s2551_s11  ;;  %s2640_s5 = sld [smem:[#allocation6 + $0x4f]]  ;;  %s2642_s6 = sld [smem:[#allocation6 + $0x53]] }
 0x118   : > { %3211 = vst [vmem:[#allocation61_spill] sm:$0xff] %v2606_v62  ;;  %3212 = vst [vmem:[#allocation62_spill] sm:$0xff] %v2616_v9  ;;  %v872_v60 = vstv %s2553_s20  ;;  %v2636_v35 = vmul.f32 %v385_v24, %v1916_v2  ;;  %v993_v21 = vstv %s2567_s23  ;;  %v1114_v10 = vstv %s2569_s22  ;;  %s2652_s11 = sld [smem:[#allocation6 + $0x57]]  ;;  %s2654_s20 = sld [smem:[#allocation6 + $0x5b]] }
 0x119   : > { %3213 = vst [vmem:[#allocation63_spill] sm:$0xff] %v2626_v1  ;;  %v2646_v41 = vmul.f32 %v509_v49, %v1916_v2  ;;  %v2649_v4 = vmul.f32 %v630_v52, %v1916_v2  ;;  %v1235_v30 = vstv %s2577_s0  ;;  %v2659_v38 = vmul.f32 %v751_v34, %v1916_v2  ;;  %s1751_s22 = smov [#allocation9]  }
 0x11a   : > { %3214 = vst [vmem:[#allocation64_spill] sm:$0xff] %v2636_v35  ;;  %v2662_v49 = vmul.f32 %v872_v60, %v1916_v2  ;;  %v2667_v59 = vmul.f32 %v993_v21, %v1916_v2  ;;  %v2670_v44 = vmul.f32 %v1114_v10, %v1916_v2  ;;  %v2676_v42 = vmul.f32 %v1235_v30, %v1916_v2  ;;  %s1673_s0 = sshll.u32 %s1751_s22, 4  ;;  %s1674_s0 = int_to_ptr.vmem [resolvable:$false] %s1673_s0 }
 0x11b   : > { %3215 = vst [vmem:[#allocation65_spill] sm:$0xff] %v2646_v41  ;;  %3216 = vst [vmem:[#allocation66_spill] sm:$0xff] %v2649_v4  ;;  %v3222_v47 = vstv %s2381_s7  ;;  %v3224_v24 = vstv %s2387_s10  ;;  %v3226_v54 = vstv %s2395_s17  ;;  %v3228_v35 = vstv %s2404_s24  ;;  %s3248_s7 = sld [smem:[#allocation24_spill]]  ;;  %s3254_s10 = sld [smem:[#allocation58_spill]] }
 0x11c   : > { %3217 = vst [vmem:[#allocation67_spill] sm:$0xff] %v2659_v38  ;;  %3218 = vst [vmem:[#allocation68_spill] sm:$0xff] %v2662_v49  ;;  %v3225_v21 = vmov %v3224_v24  ;;  %v3227_v4 = vmov %v3226_v54  ;;  %v3230_v9 = vstv %s2407_s29  ;;  %s3262_s17 = sld [smem:[#allocation59_spill]]  ;;  %s2878_s24 = sld [smem:[#allocation6 + $0x5f]] }
 0x11d   : > { %3219 = vst [vmem:[#allocation69_spill] sm:$0xff] %v2667_v59  ;;  %3220 = vst [vmem:[#allocation70_spill] sm:$0xff] %v2670_v44  ;;  %v3223_v59 = vmov %v3222_v47  ;;  %v3231_v62 = vmov %v3230_v9  ;;  %s3369_s29 = sld [smem:[#allocation23_spill]] }
 0x11e   : > { %3221 = vst [vmem:[#allocation71_spill] sm:$0xff] %v2676_v42 }
 0x15f   : > { %v238_v2 = vpop.permute.xlu1 %237 }
 0x160   : > { %v236_v10 = vpop.permute.xlu0 %235 }
 0x161   : > { %v240_v30 = vsel %vm239_vm1, %v236_v10, %v238_v2  ;;  %v241_v52 = vsel %vm239_vm1, %v238_v2, %v236_v10  ;;  %v3229_v10 = vmov %v3228_v35 }
 0x162   : > { %v325_v44 = vmul.f32 %v3222_v47, %v240_v30  ;;  %v326_v49 = vmul.f32 %v3223_v59, %v241_v52  ;;  %v449_v34 = vmul.f32 %v3224_v24, %v240_v30  ;;  %v450_v42 = vmul.f32 %v3225_v21, %v241_v52 }
 0x163   : > { %v570_v38 = vmul.f32 %v3226_v54, %v240_v30  ;;  %v571_v41 = vmul.f32 %v3227_v4, %v241_v52  ;;  %v691_v1 = vmul.f32 %v3228_v35, %v240_v30  ;;  %v692_v2 = vmul.f32 %v3229_v10, %v241_v52 }
 0x164   : > { %v329_v60 = vcombine.low %v325_v44, %v326_v49  ;;  %v453_v40 = vcombine.low %v449_v34, %v450_v42  ;;  %v812_v47 = vmul.f32 %v3230_v9, %v240_v30  ;;  %v813_v59 = vmul.f32 %v3231_v62, %v241_v52 }
 0x165   : > { %v574_v24 = vcombine.low %v570_v38, %v571_v41  ;;  %v695_v0 = vcombine.low %v691_v1, %v692_v2  ;;  %v3232_v21 = vstv %s2413_s30  ;;  %v3234_v10 = vstv %s2418_s18  ;;  %s1398_s30 = sshll.u32 %s3369_s29, 4  ;;  %s3384_s18 = sld [smem:[#allocation18_spill]] }
 0x166   : > { %v933_v37 = vmul.f32 %v3232_v21, %v240_v30  ;;  %v3233_v3 = vmov %v3232_v21  ;;  %v331_v4 = vadd.f32 %v329_v60, %v2482_v36  ;;  %v455_v35 = vadd.f32 %v453_v40, %v2496_v46 }
 0x167   : > { %v934_v54 = vmul.f32 %v3233_v3, %v241_v52  ;;  %v816_v12 = vcombine.low %v812_v47, %v813_v59  ;;  %v1054_v58 = vmul.f32 %v3234_v10, %v240_v30  ;;  %v576_v42 = vadd.f32 %v574_v24, %v2501_v61 }
 0x168   : > { %v697_v44 = vadd.f32 %v695_v0, %v2512_v39  ;;  %v3235_v9 = vmov %v3234_v10  ;;  %v3236_v1 = vrot.slane %v2431_v45, 9  ;;  %v3237_v3 = vrot.slane %v2434_v53, 9  ;;  %v261_v39 = vpop.permute.xlu1 %260  ;;  %v259_v45 = vpop.permute.xlu0 %258 }
 0x169   : > { %v937_v62 = vcombine.low %v933_v37, %v934_v54  ;;  %v1055_v38 = vmul.f32 %v3235_v9, %v241_v52  ;;  %v818_v36 = vadd.f32 %v816_v12, %v2517_v63  ;;  %v3238_v40 = vstv %s2449_s12  ;;  %s213_s12 = scalar_lea.vmem [#allocation9], %s1398_s30 }
 0x16a   : > { %v339_v41 = vadd.f32 %v3236_v1, %v331_v4  ;;  %v463_v49 = vadd.f32 %v3237_v3, %v455_v35  ;;  %v1175_v46 = vmul.f32 %v3238_v40, %v240_v30  ;;  %v3239_v34 = vrot.slane %v2441_v48, 9 }
 0x16b   : > { %v3240_v61 = vrot.slane %v2444_v43, 9  ;;  %v939_v37 = vadd.f32 %v937_v62, %v2529_v5  ;;  %v1058_v0 = vcombine.low %v1054_v58, %v1055_v38  ;;  %v3241_v47 = vrot.slane %v2472_v11, 9 }
 0x16c   : > { %v584_v60 = vadd.f32 %v3239_v34, %v576_v42  ;;  %v3242_v59 = vmov %v3238_v40  ;;  %v3243_v63 = vcombine.low %v2089_v22, %v2091_v23  ;;  %v3244_v43 = vcombine.low %v2096_v25, %v2098_v26 }
 0x16d   : > { %v705_v2 = vadd.f32 %v3240_v61, %v697_v44  ;;  %v826_v53 = vadd.f32 %v3241_v47, %v818_v36  ;;  %v1176_v12 = vmul.f32 %v3242_v59, %v241_v52  ;;  %v3245_v58 = vrot.slane %v2485_v7, 9 }
 0x16e   : > { %v348_v48 = vadd.f32 %v3243_v63, %v339_v41  ;;  %v472_v5 = vadd.f32 %v3244_v43, %v463_v49  ;;  %v1060_v11 = vadd.f32 %v1058_v0, %v2543_v55  ;;  %v3246_v24 = vcombine.low %v2102_v32, %v2110_v33 }
 0x16f   : > { %v947_v30 = vadd.f32 %v3245_v58, %v939_v37  ;;  %v3247_v22 = vcombine.low %v2114_v50, %v2120_v51  ;;  %v1179_v21 = vcombine.low %v1175_v46, %v1176_v12  ;;  %v3249_v25 = vcombine.low %v2124_v56, %v2128_v57 }
 0x170   : > { %v593_v52 = vadd.f32 %v3246_v24, %v584_v60  ;;  %v262_v7 = vsel %vm239_vm1, %v259_v45, %v261_v39  ;;  %v263_v55 = vsel %vm239_vm1, %v261_v39, %v259_v45  ;;  %v3250_v32 = vrot.slane %v2532_v6, 9 }
 0x171   : > { %v714_v23 = vadd.f32 %v3247_v22, %v705_v2  ;;  %v835_v26 = vadd.f32 %v3249_v25, %v826_v53  ;;  %v3251_v50 = vcombine.low %v2134_v27, %v2138_v31  ;;  %v3252_v54 = vstv %s2451_s13 }
 0x172   : > { %v1068_v33 = vadd.f32 %v3250_v32, %v1060_v11  ;;  %v351_v4 = vmul.f32 %v3252_v54, %v262_v7  ;;  %v3253_v35 = vmov %v3252_v54  ;;  %v1181_v57 = vadd.f32 %v1179_v21, %v2558_v8 }
 0x173   : > { %v956_v51 = vadd.f32 %v3251_v50, %v947_v30  ;;  %v352_v56 = vmul.f32 %v3253_v35, %v263_v55  ;;  %v3255_v10 = vstv %s2457_s14  ;;  %v3257_v9 = vstv %s2465_s16  ;;  %v283_v35 = vpop.permute.xlu1 %282  ;;  %s1538_s14 = sshll.u32 %s3384_s18, 8  ;;  %s1294_s16 = sshll.u32 %s213_s12, 4  ;;  %s3009_s16 = int_to_ptr.vmem [resolvable:$true] %s1294_s16 }
 0x174   : > { %v475_v42 = vmul.f32 %v3255_v10, %v262_v7  ;;  %v3256_v44 = vmov %v3255_v10  ;;  %v596_v6 = vmul.f32 %v3257_v9, %v262_v7  ;;  %v3258_v38 = vcombine.low %v2142_v29, %v2150_v28  ;;  %s1669_s23 = scalar_lea.vmem %s3009_s16, 256  ;;  %p1676_p7 = scmp.lt.s32.totalorder %s3009_s16, %s1674_s0 }
 0x175   : > { %v476_v62 = vmul.f32 %v3256_v44, %v263_v55  ;;  %v355_v31 = vcombine.low %v351_v4, %v352_v56  ;;  %v3259_v1 = vmov %v3257_v9  ;;  %v3260_v3 = vstv %s3248_s7  ;;  %p1670_p6 = scmp.ne.s32.totalorder %s3009_s16, %s1669_s23 }
 0x176   : > { %v1077_v27 = vadd.f32 %v3258_v38, %v1068_v33  ;;  %v597_v41 = vmul.f32 %v3259_v1, %v263_v55  ;;  %v717_v49 = vmul.f32 %v3260_v3, %v262_v7  ;;  %v3261_v36 = vrot.slane %v2546_v13, 9  ;;  %v3286_v1 = vld [vmem:[#allocation30_spill] sm:$0xff] }
 0x177   : > { %v479_v40 = vcombine.low %v475_v42, %v476_v62  ;;  %v3263_v46 = vmov %v3260_v3  ;;  %v3264_v60 = vstv %s2475_s28  ;;  %v357_v2 = vadd.f32 %v355_v31, %v348_v48  ;;  %v3278_v42 = vld [vmem:[#allocation26_spill] sm:$0xff]  ;;  %v3288_v3 = vld [vmem:[#allocation61_spill] sm:$0xff]  ;;  %p1671_p13 = pnand %p1670_p6, %p1851_p8 }
 0x178   : > { %v1189_v8 = vadd.f32 %v3261_v36, %v1181_v57  ;;  %v718_v34 = vmul.f32 %v3263_v46, %v263_v55  ;;  %v838_v61 = vmul.f32 %v3264_v60, %v262_v7  ;;  %v600_v37 = vcombine.low %v596_v6, %v597_v41  ;;  %v3282_v6 = vld [vmem:[#allocation27_spill] sm:$0xff]  ;;  %v3291_v46 = vld [vmem:[#allocation32_spill] sm:$0xff] }
 0x179   : > { %v3265_v28 = vmov %v3264_v60  ;;  %v3266_v0 = vstv %s3254_s10  ;;  %v3267_v45 = vcombine.low %v2154_v20, %v2160_v15  ;;  %v481_v47 = vadd.f32 %v479_v40, %v472_v5  ;;  %v3290_v40 = vld [vmem:[#allocation31_spill] sm:$0xff]  ;;  %p1672_p3 = pneg %p1671_p13 }
 0x17a   : > { %v839_v29 = vmul.f32 %v3265_v28, %v263_v55  ;;  %v959_v39 = vmul.f32 %v3266_v0, %v262_v7  ;;  %v721_v53 = vcombine.low %v717_v49, %v718_v34  ;;  %v3268_v59 = vmov %v3266_v0  ;;  %v3294_v28 = vld [vmem:[#allocation34_spill] sm:$0xff] }
 0x17b   : > { %v1198_v13 = vadd.f32 %v3267_v45, %v1189_v8  ;;  %v960_v12 = vmul.f32 %v3268_v59, %v263_v55  ;;  %v3269_v63 = vrot.slane %v2549_v14, 10  ;;  %v602_v58 = vadd.f32 %v600_v37, %v593_v52  ;;  %v281_v52 = vpop.permute.xlu0 %280  ;;  %v3293_v37 = vld [vmem:[#allocation33_spill] sm:$0xff] }
 0x17c   : > { %v842_v48 = vcombine.low %v838_v61, %v839_v29  ;;  %v3270_v30 = vstv %s3262_s17  ;;  %v3271_v24 = vrot.slane %v2561_v16, 10  ;;  %v723_v21 = vadd.f32 %v721_v53, %v714_v23  ;;  %v3277_v23 = vld [vmem:[#allocation25_spill] sm:$0xff] }
 0x17d   : > { %v365_v43 = vadd.f32 %v3269_v63, %v357_v2  ;;  %v1080_v11 = vmul.f32 %v3270_v30, %v262_v7  ;;  %v963_v25 = vcombine.low %v959_v39, %v960_v12  ;;  %v3272_v32 = vmov %v3270_v30  ;;  %v3299_v12 = vld [vmem:[#allocation35_spill] sm:$0xff]  ;;  %v3300_v63 = vld [vmem:[#allocation36_spill] sm:$0xff] }
 0x17e   : > { %v489_v22 = vadd.f32 %v3271_v24, %v481_v47  ;;  %v1081_v15 = vmul.f32 %v3272_v32, %v263_v55  ;;  %v3273_v20 = vrot.slane %v2564_v17, 10  ;;  %v844_v33 = vadd.f32 %v842_v48, %v835_v26  ;;  %v3280_v17 = vld [vmem:[#allocation60_spill] sm:$0xff]  ;;  %v3304_v24 = vld [vmem:[#allocation63_spill] sm:$0xff] }
 0x17f   : > { %v3274_v50 = vstv %s2521_s27  ;;  %v3276_v56 = vrot.slane %v2575_v18, 10  ;;  %v965_v16 = vadd.f32 %v963_v25, %v956_v51  ;;  %v3279_v44 = vcombine.low %v3277_v23, %v3278_v42  ;;  %v3285_v18 = vld [vmem:[#allocation29_spill] sm:$0xff]  ;;  %v3315_v23 = vld [vmem:[#allocation40_spill] sm:$0xff]  ;;  %s1280_s27 = scalar_lea.sflag [#allocation4], %s3369_s29 }
 0x180   : > { %v610_v5 = vadd.f32 %v3273_v20, %v602_v58  ;;  %v1201_v54 = vmul.f32 %v3274_v50, %v262_v7  ;;  %v3275_v4 = vmov %v3274_v50  ;;  %v1084_v10 = vcombine.low %v1080_v11, %v1081_v15  ;;  %v3309_v50 = vld [vmem:[#allocation37_spill] sm:$0xff] }
 0x181   : > { %v1202_v14 = vmul.f32 %v3275_v4, %v263_v55  ;;  %v731_v57 = vadd.f32 %v3276_v56, %v723_v21  ;;  %v374_v62 = vadd.f32 %v3279_v44, %v365_v43  ;;  %v3281_v9 = vrot.slane %v3280_v17, 10  ;;  %v3283_v55 = vld [vmem:[#allocation28_spill] sm:$0xff] }
 0x182   : > { %v3284_v38 = vcombine.low %v3282_v6, %v3283_v55  ;;  %v3287_v41 = vcombine.low %v3285_v18, %v3286_v1  ;;  %v3289_v49 = vrot.slane %v3288_v3, 10  ;;  %v1086_v8 = vadd.f32 %v1084_v10, %v1077_v27  ;;  %v3297_v27 = vld [vmem:[#allocation62_spill] sm:$0xff]  ;;  %v3314_v10 = vld [vmem:[#allocation39_spill] sm:$0xff] }
 0x183   : > { %v852_v26 = vadd.f32 %v3281_v9, %v844_v33  ;;  %v1205_v7 = vcombine.low %v1201_v54, %v1202_v14  ;;  %v3292_v34 = vcombine.low %v3290_v40, %v3291_v46  ;;  %v284_v61 = vsel %vm239_vm1, %v281_v52, %v283_v35  ;;  %v3310_v54 = vld [vmem:[#allocation38_spill] sm:$0xff] }
 0x184   : > { %v498_v31 = vadd.f32 %v3284_v38, %v489_v22  ;;  %v619_v51 = vadd.f32 %v3287_v41, %v610_v5  ;;  %v973_v36 = vadd.f32 %v3289_v49, %v965_v16  ;;  %v3295_v29 = vcombine.low %v3293_v37, %v3294_v28 }
 0x185   : > { %v740_v60 = vadd.f32 %v3292_v34, %v731_v57  ;;  %v1207_v2 = vadd.f32 %v1205_v7, %v1198_v13  ;;  %v285_v39 = vsel %vm239_vm1, %v283_v35, %v281_v52  ;;  %v3296_v45 = vstv %s2583_s1  ;;  %v3322_v34 = vld [vmem:[#allocation64_spill] sm:$0xff]  ;;  %s1675_s1 = scalar_lea.vmem %s1674_s0, 512 }
 0x186   : > { %v861_v0 = vadd.f32 %v3295_v29, %v852_v26  ;;  %v377_v47 = vmul.f32 %v3296_v45, %v284_v61  ;;  %v3298_v53 = vrot.slane %v3297_v27, 10  ;;  %v3301_v43 = vcombine.low %v3299_v12, %v3300_v63  ;;  %p1677_p12 = scmp.lt.s32.totalorder %s1675_s1, %s1669_s23 }
 0x187   : > { %v3302_v48 = vmov %v3296_v45  ;;  %v3303_v13 = vstv %s2591_s2  ;;  %v3305_v22 = vrot.slane %v3304_v24, 10  ;;  %v3307_v15 = vstv %s2593_s3 }
 0x188   : > { %v1094_v59 = vadd.f32 %v3298_v53, %v1086_v8  ;;  %v982_v58 = vadd.f32 %v3301_v43, %v973_v36  ;;  %v378_v30 = vmul.f32 %v3302_v48, %v285_v39  ;;  %v501_v11 = vmul.f32 %v3303_v13, %v284_v61  ;;  %v3330_v48 = vld [vmem:[#allocation67_spill] sm:$0xff]  ;;  %p1678_p0 = por %p1677_p12, %p1676_p7 }
 0x189   : > { %v1215_v21 = vadd.f32 %v3305_v22, %v1207_v2  ;;  %v3306_v25 = vmov %v3303_v13  ;;  %v622_v20 = vmul.f32 %v3307_v15, %v284_v61  ;;  %v3308_v5 = vmov %v3307_v15  ;;  %v3333_v15 = vld [vmem:[#allocation41_spill] sm:$0xff] }
 0x18a   : > { %v502_v32 = vmul.f32 %v3306_v25, %v285_v39  ;;  %v623_v33 = vmul.f32 %v3308_v5, %v285_v39  ;;  %v3311_v4 = vcombine.low %v3309_v50, %v3310_v54  ;;  %v381_v35 = vcombine.low %v377_v47, %v378_v30  ;;  %v303_v25 = vpop.permute.xlu0 %302  ;;  %v3336_v50 = vld [vmem:[#allocation43_spill] sm:$0xff]  ;;  %v3337_v54 = vld [vmem:[#allocation44_spill] sm:$0xff]  ;;  %p1679_p2 = pnand %p1678_p0, %p1672_p3 }
 0x18b   : > { %v3312_v52 = vstv %s2599_s15  ;;  %v3316_v42 = vcombine.low %v3314_v10, %v3315_v23  ;;  %v3317_v26 = vstv %s2601_s8  ;;  %v3319_v1 = vstv %s2609_s21  ;;  %v3344_v23 = vld [vmem:[#allocation47_spill] sm:$0xff] }
 0x18c   : > { %v1103_v14 = vadd.f32 %v3311_v4, %v1094_v59  ;;  %v743_v56 = vmul.f32 %v3312_v52, %v284_v61  ;;  %v3313_v57 = vmov %v3312_v52  ;;  %v505_v17 = vcombine.low %v501_v11, %v502_v32  ;;  %v3327_v59 = vld [vmem:[#allocation66_spill] sm:$0xff]  ;;  %v3340_v52 = vld [vmem:[#allocation46_spill] sm:$0xff] }
 0x18d   : > { %v744_v16 = vmul.f32 %v3313_v57, %v285_v39  ;;  %v1224_v44 = vadd.f32 %v3316_v42, %v1215_v21  ;;  %v626_v9 = vcombine.low %v622_v20, %v623_v33  ;;  %v864_v7 = vmul.f32 %v3317_v26, %v284_v61  ;;  %v305_v21 = vpop.permute.xlu1 %304  ;;  %v3334_v20 = vld [vmem:[#allocation42_spill] sm:$0xff]  ;;  %v3345_v42 = vld [vmem:[#allocation48_spill] sm:$0xff] }
 0x18e   : > { %v383_v6 = vadd.f32 %v381_v35, %v374_v62  ;;  %v3318_v38 = vmov %v3317_v26  ;;  %v985_v41 = vmul.f32 %v3319_v1, %v284_v61  ;;  %v507_v3 = vadd.f32 %v505_v17, %v498_v31  ;;  %v3325_v62 = vld [vmem:[#allocation65_spill] sm:$0xff]  ;;  %v3339_v35 = vld [vmem:[#allocation45_spill] sm:$0xff]  ;;  %v3342_v57 = vld [vmem:[#allocation68_spill] sm:$0xff] }
 0x18f   : > { %v747_v55 = vcombine.low %v743_v56, %v744_v16  ;;  %v865_v18 = vmul.f32 %v3318_v38, %v285_v39  ;;  %v628_v49 = vadd.f32 %v626_v9, %v619_v51  ;;  %v3320_v36 = vmov %v3319_v1  ;;  %v3347_v26 = vld [vmem:[#allocation69_spill] sm:$0xff]  ;;  %v3349_v1 = vld [vmem:[#allocation70_spill] sm:$0xff] }
 0x190   : > { %v986_v8 = vmul.f32 %v3320_v36, %v285_v39  ;;  %v3321_v40 = vstv %s2611_s19  ;;  %v3323_v2 = vrot.slane %v3322_v34, 11  ;;  %v3326_v27 = vrot.slane %v3325_v62, 11  ;;  %v3352_v36 = vld [vmem:[#allocation50_spill] sm:$0xff] }
 0x191   : > { %v1106_v46 = vmul.f32 %v3321_v40, %v284_v61  ;;  %v749_v28 = vadd.f32 %v747_v55, %v740_v60  ;;  %v868_v29 = vcombine.low %v864_v7, %v865_v18  ;;  %v3324_v45 = vmov %v3321_v40 }
 0x192   : > { %v391_v37 = vadd.f32 %v3323_v2, %v383_v6  ;;  %v1107_v47 = vmul.f32 %v3324_v45, %v285_v39  ;;  %v515_v53 = vadd.f32 %v3326_v27, %v507_v3  ;;  %v3328_v12 = vrot.slane %v3327_v59, 11 }
 0x193   : > { %v989_v43 = vcombine.low %v985_v41, %v986_v8  ;;  %v3329_v31 = vstv %s2620_s26  ;;  %v3331_v30 = vrot.slane %v3330_v48, 11  ;;  %v870_v11 = vadd.f32 %v868_v29, %v861_v0 }
 0x194   : > { %v636_v63 = vadd.f32 %v3328_v12, %v628_v49  ;;  %v1227_v51 = vmul.f32 %v3329_v31, %v284_v61  ;;  %v1110_v24 = vcombine.low %v1106_v46, %v1107_v47  ;;  %v3332_v22 = vmov %v3329_v31  ;;  %v3351_v49 = vld [vmem:[#allocation49_spill] sm:$0xff] }
 0x195   : > { %v757_v13 = vadd.f32 %v3331_v30, %v749_v28  ;;  %v1228_v60 = vmul.f32 %v3332_v22, %v285_v39  ;;  %v991_v32 = vadd.f32 %v989_v43, %v982_v58  ;;  %v3335_v5 = vcombine.low %v3333_v15, %v3334_v20  ;;  %v3359_v28 = vld [vmem:[#allocation52_spill] sm:$0xff]  ;;  %v3364_v12 = vld [vmem:[#allocation71_spill] sm:$0xff] }
 0x196   : > { %v3338_v4 = vcombine.low %v3336_v50, %v3337_v54  ;;  %v3341_v56 = vcombine.low %v3339_v35, %v3340_v52  ;;  %v3343_v16 = vrot.slane %v3342_v57, 11  ;;  %v1112_v10 = vadd.f32 %v1110_v24, %v1103_v14  ;;  %v3366_v31 = vld [vmem:[#allocation53_spill] sm:$0xff]  ;;  %v3375_v50 = vld [vmem:[#allocation56_spill] sm:$0xff] }
 0x197   : > { %v400_v33 = vadd.f32 %v3335_v5, %v391_v37  ;;  %v1231_v58 = vcombine.low %v1227_v51, %v1228_v60  ;;  %v3346_v17 = vcombine.low %v3344_v23, %v3345_v42  ;;  %v3348_v7 = vrot.slane %v3347_v26, 11  ;;  %v3367_v51 = vld [vmem:[#allocation54_spill] sm:$0xff]  ;;  %v3374_v5 = vld [vmem:[#allocation55_spill] sm:$0xff] }
 0x198   : > { %v524_v61 = vadd.f32 %v3338_v4, %v515_v53  ;;  %v645_v0 = vadd.f32 %v3341_v56, %v636_v63  ;;  %v878_v39 = vadd.f32 %v3343_v16, %v870_v11  ;;  %v1252_v55 = vstv %s2878_s24 }
 0x199   : > { %v766_v9 = vadd.f32 %v3346_v17, %v757_v13  ;;  %v999_v6 = vadd.f32 %v3348_v7, %v991_v32  ;;  %v306_v38 = vsel %vm239_vm1, %v303_v25, %v305_v21  ;;  %v307_v18 = vsel %vm239_vm1, %v305_v21, %v303_v25 }
 0x19a   : > { %v3350_v41 = vrot.slane %v3349_v1, 11  ;;  %v1233_v3 = vadd.f32 %v1231_v58, %v1224_v44  ;;  %v3353_v8 = vcombine.low %v3351_v49, %v3352_v36  ;;  %v3354_v46 = vstv %s2622_s9  ;;  %s3386_s9 = sld [smem:[#allocation75_spill]] }
 0x19b   : > { %v403_v34 = vmul.f32 %v3354_v46, %v306_v38  ;;  %v3355_v2 = vlaneseq  ;;  %v3360_v29 = vcombine.low %v3358_v19, %v3359_v28  ;;  %v3361_v47 = vmov %v3354_v46 }
 0x19c   : > { %v1120_v14 = vadd.f32 %v3350_v41, %v1112_v10  ;;  %v887_v40 = vadd.f32 %v3353_v8, %v878_v39  ;;  %v404_v62 = vmul.f32 %v3361_v47, %v307_v18  ;;  %v3362_v44 = vstv %s2630_s4 }
 0x19d   : > { %vm2931_vm2 = vcmp.lt.s32.totalorder %v3355_v2, 256  ;;  %v1008_v45 = vadd.f32 %v3360_v29, %v999_v6  ;;  %v527_v27 = vmul.f32 %v3362_v44, %v306_v38  ;;  %v3363_v53 = vmov %v3362_v44 }
 0x19e   : > { %v528_v59 = vmul.f32 %v3363_v53, %v307_v18  ;;  %v3365_v63 = vrot.slane %v3364_v12, 11  ;;  %v3368_v48 = vcombine.low %v3366_v31, %v3367_v51  ;;  %v3370_v13 = vstv %s2632_s25 }
 0x19f   : > { %v648_v11 = vmul.f32 %v3370_v13, %v306_v38  ;;  %v3371_v24 = vmov %v3370_v13  ;;  %v407_v60 = vcombine.low %v403_v34, %v404_v62  ;;  %v3372_v25 = vstv %s2640_s5 }
 0x1a0   : > { %v1241_v43 = vadd.f32 %v3365_v63, %v1233_v3  ;;  %v1129_v30 = vadd.f32 %v3368_v48, %v1120_v14  ;;  %v649_v22 = vmul.f32 %v3371_v24, %v307_v18  ;;  %v531_v21 = vcombine.low %v527_v27, %v528_v59  ;;  %v3382_v14 = vld [vmem:[#allocation57_spill] sm:$0xff]  ;;  %s3007_s25 = scalar_lea.hbm %s3386_s9, %s1538_s14 }
 0x1a1   : > { %v769_v32 = vmul.f32 %v3372_v25, %v306_v38  ;;  %v3373_v15 = vmov %v3372_v25  ;;  %v3376_v54 = vcombine.low %v3374_v5, %v3375_v50  ;;  %v3377_v52 = vstv %s2642_s6 }
 0x1a2   : > { %v770_v20 = vmul.f32 %v3373_v15, %v307_v18  ;;  %v652_v35 = vcombine.low %v648_v11, %v649_v22  ;;  %v890_v56 = vmul.f32 %v3377_v52, %v306_v38  ;;  %v3378_v57 = vmov %v3377_v52 }
 0x1a3   : > { %v1250_v4 = vadd.f32 %v3376_v54, %v1241_v43  ;;  %v891_v16 = vmul.f32 %v3378_v57, %v307_v18  ;;  %v409_v39 = vadd.f32 %v407_v60, %v400_v33  ;;  %v533_v10 = vadd.f32 %v531_v21, %v524_v61 }
 0x1a4   : > { %v773_v58 = vcombine.low %v769_v32, %v770_v20  ;;  %v3379_v23 = vstv %s2652_s11  ;;  %v654_v17 = vadd.f32 %v652_v35, %v645_v0  ;;  %v3381_v1 = vstv %s2654_s20 }
 0x1a5   : > { %v1011_v42 = vmul.f32 %v3379_v23, %v306_v38  ;;  %v894_v26 = vcombine.low %v890_v56, %v891_v16  ;;  %v3380_v7 = vmov %v3379_v23  ;;  %v1132_v41 = vmul.f32 %v3381_v1, %v306_v38 }
 0x1a6   : > { %v1012_v6 = vmul.f32 %v3380_v7, %v307_v18  ;;  %v417_v3 = vrot.slane %v409_v39, %v3382_v14  ;;  %v541_v49 = vrot.slane %v533_v10, %v3382_v14  ;;  %v775_v36 = vadd.f32 %v773_v58, %v766_v9 }
 0x1a7   : > { %v3383_v8 = vmov %v3381_v1  ;;  %v662_v33 = vrot.slane %v654_v17, %v3382_v14  ;;  %v896_v61 = vadd.f32 %v894_v26, %v887_v40  ;;  %v1253_v2 = vmul.f32 %v1252_v55, %v306_v38 }
 0x1a8   : > { %v1133_v46 = vmul.f32 %v3383_v8, %v307_v18  ;;  %v1015_v34 = vcombine.low %v1011_v42, %v1012_v6  ;;  %v424_v19 = vrot.slane %v417_v3, %v3382_v14  ;;  %v548_v0 = vrot.slane %v541_v49, %v3382_v14 }
 0x1a9   : > { %v783_v28 = vrot.slane %v775_v36, %v3382_v14  ;;  %v669_v47 = vrot.slane %v662_v33, %v3382_v14  ;;  %v904_v62 = vrot.slane %v896_v61, %v3382_v14  ;;  %v1254_v9 = vmul.f32 %v1252_v55, %v307_v18 }
 0x1aa   : > { %v1136_v29 = vcombine.low %v1132_v41, %v1133_v46  ;;  %v1017_v44 = vadd.f32 %v1015_v34, %v1008_v45  ;;  %430 = vst.msk [vmem:[%s213_s12] ss:$8 sm:$0x3] %vm2931_vm2, %v424_v19  ;;  %1429 = vst.msk [vmem:[%s213_s12 + $0x1] ss:$8 sm:$0x3] %vm2931_vm2, %v548_v0 }
 0x1ab   : > { %v790_v27 = vrot.slane %v783_v28, %v3382_v14  ;;  %v911_v38 = vrot.slane %v904_v62, %v3382_v14  ;;  %v1257_v59 = vcombine.low %v1253_v2, %v1254_v9  ;;  %1446 = vst.msk [vmem:[%s213_s12 + $0x2] ss:$8 sm:$0x3] %vm2931_vm2, %v669_v47 }
 0x1ac   : > { %v1138_v53 = vadd.f32 %v1136_v29, %v1129_v30  ;;  %v1025_v40 = vrot.slane %v1017_v44, %v3382_v14 }
 0x1ad   : > { %1463 = vst.msk [vmem:[%s213_s12 + $0x3] ss:$8 sm:$0x3] %vm2931_vm2, %v790_v27  ;;  %v1259_v45 = vadd.f32 %v1257_v59, %v1250_v4  ;;  %1480 = vst.msk [vmem:[%s213_s12 + $0x4] ss:$8 sm:$0x3] %vm2931_vm2, %v911_v38 }
 0x1ae   : > { %v1146_v55 = vrot.slane %v1138_v53, %v3382_v14  ;;  %v1032_v18 = vrot.slane %v1025_v40, %v3382_v14 }
 0x1af   : > { %v1267_v63 = vrot.slane %v1259_v45, %v3382_v14 }
 0x1b0   : > { %v1153_v12 = vrot.slane %v1146_v55, %v3382_v14  ;;  %1497 = vst.msk [vmem:[%s213_s12 + $0x5] ss:$8 sm:$0x3] %vm2931_vm2, %v1032_v18 }
 0x1b1   : > { %v1274_v43 = vrot.slane %v1267_v63, %v3382_v14 }
 0x1b2   : > { %1514 = vst.msk [vmem:[%s213_s12 + $0x6] ss:$8 sm:$0x3] %vm2931_vm2, %v1153_v12 }
 0x1b3   : > { %1531 = vst.msk [vmem:[%s213_s12 + $0x7] ss:$8 sm:$0x3] %vm2931_vm2, %v1274_v43 }
 0x1b4   : > { %1682 = shalt.err (!%p1679_p2)
}
 0x1b5   : > { %s1683_s2 = scalar_lea.hbm %s3007_s25, 256  ;;  %s1687_s8 = scalar_lea.hbm %s3386_s9, 512 }
 0x1b6   : > { %p1684_p10 = scmp.ne.s32.totalorder %s3007_s25, %s1683_s2  ;;  %p1688_p11 = scmp.lt.u32.totalorder %s3007_s25, %s3386_s9 }
 0x1b7   : > { %p1689_p9 = scmp.lt.u32.totalorder %s1687_s8, %s1683_s2  ;;  %p1691_p6 = scmp.lt.u32.totalorder %s1683_s2, %s3007_s25 }
 0x1b8   : > { %p1685_p5 = pnand %p1684_p10, %p1851_p8 }
 0x1b9   : > { %p1690_p4 = por %p1689_p9, %p1688_p11 }
 0x1ba   : > { %p1686_p1 = pneg %p1685_p5 }
 0x1bb   : > { %p1692_p13 = por %p1691_p6, %p1690_p4 }
 0x1bd   : > { %p1693_p3 = pnand %p1692_p13, %p1686_p1 }
 0x1bf   : > { %1696 = shalt.err (!%p1693_p3)
}
 0x1c0   : > { %1549 = dma.vmem_to_hbm [thread:$0]  (%p1851_p8), %s3009_s16, 256, %s3007_s25, %s1280_s27  }
 0x1c1 PF: > { %s3387_s4 = sld [smem:[#allocation14_spill]]  ;;  %s3388_s5 = sld [smem:[#allocation19_spill]] }
 0x1c2   : > { %s3389_s6 = sld [smem:[#allocation17_spill]] }
 0x1c7   : > { %s1306_s11 = sand.u32 1, %s3387_s4   ;;  %p3390_p7 = scmp.ne.s32.totalorder %s3388_s5, 0 }
 0x1c8   : > { %p3391_p12 = scmp.ge.s32.totalorder %s3389_s6, 2  ;;  %s1307_s20 = scalar_lea.sflag [#allocation4], %s1306_s11 }
 0x1ca   : > { %p1563_p0 = pnand %p3391_p12, %p3390_p7 }
 0x1cc   : > { %1726 = dma.done.wait (!%p1563_p0), %s1307_s20, 256  }
 0x1cd   : > { %1728 = vsyncadd (!%p1563_p0), %s1307_s20, 4294967040  ;;  %s3392_s15 = sld [smem:[#allocation20_spill]]  ;;  %s3393_s12 = sld [smem:[#allocation15_spill]] }
 0x1ce   : > { %s3394_s13 = sld [smem:[#allocation16_spill]]  ;;  %s3395_s14 = sld [smem:[#allocation21_spill]] }
 0x1d3   : > { %p18_p2 = scmp.ge.s32.totalorder %s3392_s15, 4  }
 0x1d5   :  { %20 = sbr.rel (!%p18_p2) target bundleno = 12 (0xc), region = 93 }
 0x1dc   :  { %1312 = vsyncpa [#allocation3], 1 }
 0x1dd   :  { %1314 = vsyncpa [#allocation3 + $0x1], 1 }
 0x1de   :  { %1315 = vsyncpa [#allocation4], 1 }
 0x1df   :  { %1317 = vsyncpa [#allocation4 + $0x1], 1 }
 0x1e0   :  { %1318 = vsyncpa [#allocation5], 1 }
 0x1e1   :  { %1320 = vsyncpa [#allocation5 + $0x1], 1 }
 0x1e2   :  { %1321 = vsyncpa [#allocation8], 1 }

</bundles_post_ra>
